<compile_context>
chip_gen: v7x
topology: tpu7x:2x2x1
jax: 0.10.0
libtpu: 0.0.40
codegen_flags: <defaults>
</compile_context>

<pallas_src>
import math

import jax
import jax.numpy as jnp
from jax import lax
from jax.experimental import pallas as pl
from jax.experimental.pallas import tpu as pltpu


# ------------------------------- fused kernel -------------------------------

def _glad_fused_kernel(x_ref, mask_ref,
                       wih_ref, whh_ref, b_ref,
                       wsc_ref, bsc_ref,
                       wq_ref, bq_ref, wk_ref, bk_ref,
                       beta_ref,
                       h_out_ref, c_out_ref):
    """Whole GLADEncoder_global_v2 forward in one kernel.

    x:    (B, T, D)        inputs
    mask: (B, T)           1.0 where t < len, else 0.0
    wih:  (D, 16H)         gate-major packed input weights for 4 LSTM dirs
                           (gate blocks [i|f|g|o] of width 4H, each ordered
                            [slot_fwd, global_fwd, slot_bwd, global_bwd] x H)
    whh:  (4H, 16H)        block-diagonal (per direction) recurrent weights
    b:    (1, 16H)         b_ih + b_hh, same packing
    wsc:  (1, F) bsc (1,1) local SelfAttention scorer (F = 2H)
    wq/wk:(F, F) bq/bk (1,F)  global v2 q/k projections (contraction-major)
    beta: (1, 1)           sigmoid(beta_raw[slot])
    h_out:(B, T, F), c_out:(B, F)
    """
    x = x_ref[...]
    mask = mask_ref[...]
    B, T, D = x.shape
    NH = whh_ref.shape[0]          # 4 directions * H
    H = NH // 4
    F = 2 * H
    G = whh_ref.shape[1]           # 4 gates * NH

    beta = beta_ref[0, 0]
    one_m_beta = 1.0 - beta

    # --- one batched input projection for all 4 directions / all timesteps ---
    xp = jnp.dot(x.reshape(B * T, D), wih_ref[...],
                 preferred_element_type=jnp.float32) + b_ref[...]
    xp = xp.reshape(B, T, G)

    # column selectors (hoisted out of the loop)
    gcol = lax.broadcasted_iota(jnp.int32, (1, G), 1)
    is_fwd_gate = (gcol % NH) < (2 * H)              # fwd dirs occupy first 2H
    hcol = lax.broadcasted_iota(jnp.int32, (1, NH), 1)
    is_fwd_hid = hcol < (2 * H)

    whh = whh_ref[...]
    h_all = jnp.zeros((B, NH), jnp.float32)
    c_all = jnp.zeros((B, NH), jnp.float32)

    # single unrolled recurrence over time; fwd dirs consume time s, bwd dirs
    # consume time T-1-s with a mask-gated carry (== per-length reversal).
    for s in range(T):
        tr = T - 1 - s
        gate_in = jnp.where(is_fwd_gate, xp[:, s, :], xp[:, tr, :])
        gates = gate_in + jnp.dot(h_all, whh, preferred_element_type=jnp.float32)

        i_g = jax.nn.sigmoid(gates[:, 0 * NH:1 * NH])
        f_g = jax.nn.sigmoid(gates[:, 1 * NH:2 * NH])
        g_g = jnp.tanh(gates[:, 2 * NH:3 * NH])
        o_g = jax.nn.sigmoid(gates[:, 3 * NH:4 * NH])

        c_upd = f_g * c_all + i_g * g_g
        h_upd = o_g * jnp.tanh(c_upd)

        m_step = jnp.where(is_fwd_hid, mask[:, s:s + 1], mask[:, tr:tr + 1])
        c_all = m_step * c_upd + (1.0 - m_step) * c_all
        h_all = m_step * h_upd + (1.0 - m_step) * h_all

        # fuse local/global with beta and emit the two halves of h per step
        h_f = (h_all[:, 0:H] * beta + h_all[:, H:2 * H] * one_m_beta) \
            * mask[:, s:s + 1]
        h_b = h_all[:, 2 * H:3 * H] * beta + h_all[:, 3 * H:4 * H] * one_m_beta
        h_out_ref[:, s, 0:H] = h_f            # fwd half of time s
        h_out_ref[:, tr, H:2 * H] = h_b       # bwd half of time T-1-s (0 if padded)

    # ------------------------- attention stage (fused) -----------------------
    h = h_out_ref[...]                        # (B, T, F), zeros at padded steps
    neg = jnp.float32(-1e30)                  # finite: avoids NaN for len==0 rows
    valid = mask > 0.5

    def masked_softmax(scores):               # softmax over T with length mask
        scores = jnp.where(valid, scores, neg)
        m = jnp.max(scores, axis=-1, keepdims=True)
        e = jnp.exp(scores - m)
        return e * pl.reciprocal(jnp.sum(e, axis=-1, keepdims=True), approx=True)

    # local SelfAttention: linear scorer + length-masked softmax over T
    sc_l = jnp.sum(h * wsc_ref[...].reshape(1, 1, F), axis=-1) + bsc_ref[0, 0]
    a_l = masked_softmax(sc_l)
    ctx_l = jnp.sum(a_l[:, :, None] * h, axis=1)

    # global SelfAttention_transformer_v2:
    #   scores[b,i] = sum_j (q_i . k_j) / sqrt(dk) = q_i . (sum_j k_j) / sqrt(dk)
    #   (sum over ALL j including padded rows, where k_j == bias, as in torch)
    h2 = h.reshape(B * T, F)
    q = (jnp.dot(h2, wq_ref[...], preferred_element_type=jnp.float32)
         + bq_ref[...]).reshape(B, T, F)
    k = (jnp.dot(h2, wk_ref[...], preferred_element_type=jnp.float32)
         + bk_ref[...]).reshape(B, T, F)
    ksum = jnp.sum(k, axis=1)                                   # (B, F)
    sc_g = jnp.sum(q * ksum[:, None, :], axis=-1) * (1.0 / math.sqrt(F))
    a_g = masked_softmax(sc_g)
    ctx_g = jnp.sum(a_g[:, :, None] * h, axis=1)

    c_out_ref[...] = ctx_l * beta + ctx_g * one_m_beta


# ----------------------------- JAX glue / wrapper ----------------------------

_VMEM = pl.BlockSpec(memory_space=pltpu.MemorySpace.VMEM)
_SMEM = pl.BlockSpec(memory_space=pltpu.MemorySpace.SMEM)


def glad_encoder_global_v2_forward(packed, x, x_len, slot):
    """Inference-mode forward (dropout = identity). Requires max(x_len) == T."""
    # TODO(synk): train-mode stochastic F.dropout is not reproduced (eval mode).
    p = packed[slot]
    B, T, _ = x.shape
    F = p['wq'].shape[0]
    mask = (jnp.arange(T)[None, :] < x_len[:, None]).astype(jnp.float32)
    beta = jnp.reshape(p['beta'], (1, 1))

    h, c = pl.pallas_call(
        _glad_fused_kernel,
        out_shape=(jax.ShapeDtypeStruct((B, T, F), jnp.float32),
                   jax.ShapeDtypeStruct((B, F), jnp.float32)),
        in_specs=[_VMEM, _VMEM,                       # x, mask
                  _VMEM, _VMEM, _VMEM,                # wih_all, whh_bd, b_all
                  _VMEM, _SMEM,                       # scorer w, scorer b
                  _VMEM, _VMEM, _VMEM, _VMEM,         # wq, bq, wk, bk
                  _SMEM],                             # beta
        out_specs=(_VMEM, _VMEM),
        # NOTE: for production B, add a grid over batch with
        # dimension_semantics=("parallel",) to use v7x's second TensorCore and
        # keep per-step VMEM under its 64 MiB; unnecessary at this toy size.
    )(x, mask, p['wih'], p['whh'], p['b'],
      p['wsc'], p['bsc'],
      p['wq'], p['bq'], p['wk'], p['bk'],
      beta)
    return h, c


# ------------------------- host-side param packing ---------------------------

def pack_params(params, slots):
    """One-time host-side repack: 4 LSTM directions batched gate-major into one
    (D, 16H) input projection + block-diagonal (4H, 16H) recurrence; all Linear
    weights pre-transposed to contraction-major layout."""
    packed = {}
    gq = params['global_selfattn']
    wq_t, wk_t = gq['wq'].T, gq['wk'].T
    bq = gq['bq'].reshape(1, -1)
    bk = gq['bk'].reshape(1, -1)
    for idx, s in enumerate(slots):
        dirs = [params[f'{s}_rnn']['fwd'], params['global_rnn']['fwd'],
                params[f'{s}_rnn']['bwd'], params['global_rnn']['bwd']]
        H = dirs[0][1].shape[1]
        nd = len(dirs)
        wih_cols, b_cols = [], []
        whh_bd = jnp.zeros((nd * H, 4 * nd * H), jnp.float32)
        for gt in range(4):                       # gate-major: [i | f | g | o]
            for d, (wih, whh, b) in enumerate(dirs):
                wih_cols.append(wih[gt * H:(gt + 1) * H, :].T)      # (D, H)
                b_cols.append(b[gt * H:(gt + 1) * H])
                whh_bd = whh_bd.at[d * H:(d + 1) * H,
                                   gt * nd * H + d * H:
                                   gt * nd * H + (d + 1) * H].set(
                                       whh[gt * H:(gt + 1) * H, :].T)
        sa = params[f'{s}_selfattn']
        packed[s] = {
            'wih': jnp.concatenate(wih_cols, axis=1),               # (D, 16H)
            'whh': whh_bd,                                          # (4H, 16H)
            'b': jnp.concatenate(b_cols).reshape(1, 4 * nd * H),    # (1, 16H)
            'wsc': sa['w'].reshape(1, -1).astype(jnp.float32),
            'bsc': sa['b'].reshape(1, 1).astype(jnp.float32),
            'wq': wq_t, 'bq': bq, 'wk': wk_t, 'bk': bk,
            'beta': jax.nn.sigmoid(params['beta_raw'][idx]).astype(jnp.float32),
        }
    return packed


# ----------------------------- deterministic init ----------------------------

def _init_lstm(key, din, dhid):
    k = 1.0 / math.sqrt(dhid)
    keys = jax.random.split(key, 8)
    p = {}
    for d, name in enumerate(('fwd', 'bwd')):
        wih = jax.random.uniform(keys[4 * d + 0], (4 * dhid, din), jnp.float32, -k, k)
        whh = jax.random.uniform(keys[4 * d + 1], (4 * dhid, dhid), jnp.float32, -k, k)
        bih = jax.random.uniform(keys[4 * d + 2], (4 * dhid,), jnp.float32, -k, k)
        bhh = jax.random.uniform(keys[4 * d + 3], (4 * dhid,), jnp.float32, -k, k)
        p[name] = (wih, whh, bih + bhh)
    return p


def _init_linear(key, fan_in, fan_out):
    k = 1.0 / math.sqrt(fan_in)
    k1, k2 = jax.random.split(key)
    w = jax.random.uniform(k1, (fan_out, fan_in), jnp.float32, -k, k)
    b = jax.random.uniform(k2, (fan_out,), jnp.float32, -k, k)
    return w, b


def init_params(key, din, dhid, slots):
    F = 2 * dhid
    keys = iter(jax.random.split(key, 5 + 2 * len(slots)))
    params = {'global_rnn': _init_lstm(next(keys), din, dhid)}

    wq, bq = _init_linear(next(keys), F, F)
    wk, bk = _init_linear(next(keys), F, F)
    wv, bv = _init_linear(next(keys), F, F)     # dead code in torch v2 forward
    params['global_selfattn'] = {
        'wq': wq, 'bq': bq, 'wk': wk, 'bk': bk,
        'wv': wv, 'bv': bv,                                    # unused (parity)
        'ln_g': jnp.ones((F,), jnp.float32),                   # unused (parity)
        'ln_b': jnp.zeros((F,), jnp.float32),                  # unused (parity)
    }
    for s in slots:
        params[f'{s}_rnn'] = _init_lstm(next(keys), din, dhid)
        w, b = _init_linear(next(keys), din, 1)   # SelfAttention(din): Linear(din,1)
        params[f'{s}_selfattn'] = {'w': w, 'b': b}
    params['beta_raw'] = jax.random.uniform(next(keys), (len(slots),),
                                            jnp.float32, -0.01, 0.01)
    return params


# ------------------------------------ main -----------------------------------

if __name__ == "__main__":
    B, T, dhid = 2, 8, 16
    din = 2 * dhid          # required so SelfAttention(din) matches h's feature dim
    slots = ("food", "area")

    key = jax.random.PRNGKey(0)
    kp, kx = jax.random.split(key)
    params = init_params(kp, din, dhid, slots)
    packed = pack_params(params, slots)

    x = jax.random.normal(kx, (B, T, din), jnp.float32)
    x_len = jnp.array([T, 5], jnp.int32)   # max(x_len) == T (pad_packed semantics)

    h, c = glad_encoder_global_v2_forward(packed, x, x_len, "food")
    h, c = jax.block_until_ready((h, c))

    assert h.shape == (B, T, 2 * dhid), h.shape
    assert c.shape == (B, 2 * dhid), c.shape
    assert bool(jnp.all(jnp.isfinite(h))) and bool(jnp.all(jnp.isfinite(c)))
    print("KERNEL_OK")
</pallas_src>

<mosaic_0001>
module attributes {stable_mosaic.version = 11 : i64} {
  func.func @_glad_fused_kernel(%arg0: memref<2x8x32xf32, #tpu.memory_space<vmem>>, %arg1: memref<2x8xf32, #tpu.memory_space<vmem>>, %arg2: memref<32x256xf32, #tpu.memory_space<vmem>>, %arg3: memref<64x256xf32, #tpu.memory_space<vmem>>, %arg4: memref<1x256xf32, #tpu.memory_space<vmem>>, %arg5: memref<1x32xf32, #tpu.memory_space<vmem>>, %arg6: memref<1x1xf32, #tpu.memory_space<smem>>, %arg7: memref<32x32xf32, #tpu.memory_space<vmem>>, %arg8: memref<1x32xf32, #tpu.memory_space<vmem>>, %arg9: memref<32x32xf32, #tpu.memory_space<vmem>>, %arg10: memref<1x32xf32, #tpu.memory_space<vmem>>, %arg11: memref<1x1xf32, #tpu.memory_space<smem>>, %arg12: memref<2x8x32xf32, #tpu.memory_space<vmem>>, %arg13: memref<2x32xf32, #tpu.memory_space<vmem>>) attributes {dimension_semantics = [], scalar_prefetch = 0 : i64, scratch_operands = 0 : i64, tpu.core_type = #tpu.core_type<tc>} {
    %c0 = arith.constant 0 : index
    %c0_0 = arith.constant 0 : index
    %c0_1 = arith.constant 0 : index
    %0 = vector.load %arg0[%c0, %c0_0, %c0_1] : memref<2x8x32xf32, #tpu.memory_space<vmem>>, vector<2x8x32xf32>
    %c0_2 = arith.constant 0 : index
    %c0_3 = arith.constant 0 : index
    %1 = vector.load %arg1[%c0_2, %c0_3] : memref<2x8xf32, #tpu.memory_space<vmem>>, vector<2x8xf32>
    %c0_4 = arith.constant 0 : index
    %c0_5 = arith.constant 0 : index
    %2 = memref.load %arg11[%c0_4, %c0_5] : memref<1x1xf32, #tpu.memory_space<smem>>
    %cst = arith.constant 1.000000e+00 : f32
    %3 = arith.subf %cst, %2 : f32
    %4 = vector.shape_cast %0 : vector<2x8x32xf32> to vector<16x32xf32>
    %c0_6 = arith.constant 0 : index
    %c0_7 = arith.constant 0 : index
    %5 = vector.load %arg2[%c0_6, %c0_7] : memref<32x256xf32, #tpu.memory_space<vmem>>, vector<32x256xf32>
    %cst_8 = arith.constant dense<0.000000e+00> : vector<16x256xf32>
    %6 = tpu.matmul %4, %5, %cst_8 {dimension_numbers = #tpu.dot_dimension_numbers<[1], [0], [0], [1], [0, 0, 1, 1], [], []>} : vector<16x32xf32>, vector<32x256xf32>, vector<16x256xf32> -> vector<16x256xf32>
    %c0_9 = arith.constant 0 : index
    %c0_10 = arith.constant 0 : index
    %7 = vector.load %arg4[%c0_9, %c0_10] : memref<1x256xf32, #tpu.memory_space<vmem>>, vector<1x256xf32>
    %8 = vector.broadcast %7 : vector<1x256xf32> to vector<16x256xf32>
    %9 = arith.addf %6, %8 : vector<16x256xf32>
    %10 = vector.shape_cast %9 : vector<16x256xf32> to vector<2x8x256xf32>
    %11 = tpu.iota {dimensions = array<i32: 1>} : vector<1x256xi32>
    %c64_i32 = arith.constant 64 : i32
    %c0_i32 = arith.constant 0 : i32
    %12 = arith.cmpi eq, %c64_i32, %c0_i32 : i32
    %c1_i32 = arith.constant 1 : i32
    %13 = arith.select %12, %c1_i32, %c64_i32 : i32
    %14 = vector.broadcast %13 : i32 to vector<1x256xi32>
    %15 = arith.remsi %11, %14 : vector<1x256xi32>
    %c0_i32_11 = arith.constant 0 : i32
    %16 = vector.broadcast %c0_i32_11 : i32 to vector<1x256xi32>
    %17 = arith.cmpi ne, %15, %16 : vector<1x256xi32>
    %c0_i32_12 = arith.constant 0 : i32
    %18 = vector.broadcast %c0_i32_12 : i32 to vector<1x256xi32>
    %19 = arith.cmpi slt, %15, %18 : vector<1x256xi32>
    %c0_i32_13 = arith.constant 0 : i32
    %20 = arith.cmpi slt, %13, %c0_i32_13 : i32
    %21 = vector.broadcast %20 : i1 to vector<1x256xi1>
    %22 = vector.broadcast %21 : vector<1x256xi1> to vector<1x256xi1>
    %23 = arith.xori %19, %22 : vector<1x256xi1>
    %24 = arith.andi %23, %17 : vector<1x256xi1>
    %25 = vector.broadcast %13 : i32 to vector<1x256xi32>
    %26 = arith.addi %15, %25 : vector<1x256xi32>
    %27 = arith.select %24, %26, %15 : vector<1x256xi1>, vector<1x256xi32>
    %c32_i32 = arith.constant 32 : i32
    %28 = vector.broadcast %c32_i32 : i32 to vector<1x256xi32>
    %29 = arith.cmpi slt, %27, %28 : vector<1x256xi32>
    %30 = tpu.iota {dimensions = array<i32: 1>} : vector<1x64xi32>
    %c32_i32_14 = arith.constant 32 : i32
    %31 = vector.broadcast %c32_i32_14 : i32 to vector<1x64xi32>
    %32 = arith.cmpi slt, %30, %31 : vector<1x64xi32>
    %c0_15 = arith.constant 0 : index
    %c0_16 = arith.constant 0 : index
    %33 = vector.load %arg3[%c0_15, %c0_16] : memref<64x256xf32, #tpu.memory_space<vmem>>, vector<64x256xf32>
    %cst_17 = arith.constant 0.000000e+00 : f32
    %34 = vector.broadcast %cst_17 : f32 to vector<2x64xf32>
    %cst_18 = arith.constant 0.000000e+00 : f32
    %35 = vector.broadcast %cst_18 : f32 to vector<2x64xf32>
    %36 = vector.extract_strided_slice %10 {offsets = [0, 0, 0], sizes = [2, 1, 256], strides = [1, 1, 1]} : vector<2x8x256xf32> to vector<2x1x256xf32>
    %37 = vector.shape_cast %36 : vector<2x1x256xf32> to vector<2x256xf32>
    %38 = vector.extract_strided_slice %10 {offsets = [0, 7, 0], sizes = [2, 1, 256], strides = [1, 1, 1]} : vector<2x8x256xf32> to vector<2x1x256xf32>
    %39 = vector.shape_cast %38 : vector<2x1x256xf32> to vector<2x256xf32>
    %40 = vector.shape_cast %29 : vector<1x256xi1> to vector<1x256xi1>
    %41 = vector.broadcast %40 : vector<1x256xi1> to vector<2x256xi1>
    %42 = arith.select %41, %37, %39 : vector<2x256xi1>, vector<2x256xf32>
    %cst_19 = arith.constant dense<0.000000e+00> : vector<2x256xf32>
    %43 = tpu.matmul %34, %33, %cst_19 {dimension_numbers = #tpu.dot_dimension_numbers<[1], [0], [0], [1], [0, 0, 1, 1], [], []>} : vector<2x64xf32>, vector<64x256xf32>, vector<2x256xf32> -> vector<2x256xf32>
    %44 = arith.addf %42, %43 : vector<2x256xf32>
    %45 = vector.extract_strided_slice %44 {offsets = [0, 0], sizes = [2, 64], strides = [1, 1]} : vector<2x256xf32> to vector<2x64xf32>
    %46 = arith.negf %45 : vector<2x64xf32>
    %47 = math.exp %46 : vector<2x64xf32>
    %cst_20 = arith.constant 1.000000e+00 : f32
    %48 = vector.broadcast %cst_20 : f32 to vector<2x64xf32>
    %49 = arith.addf %48, %47 : vector<2x64xf32>
    %50 = arith.divf %48, %49 : vector<2x64xf32>
    %51 = vector.extract_strided_slice %44 {offsets = [0, 64], sizes = [2, 64], strides = [1, 1]} : vector<2x256xf32> to vector<2x64xf32>
    %52 = arith.negf %51 : vector<2x64xf32>
    %53 = math.exp %52 : vector<2x64xf32>
    %cst_21 = arith.constant 1.000000e+00 : f32
    %54 = vector.broadcast %cst_21 : f32 to vector<2x64xf32>
    %55 = arith.addf %54, %53 : vector<2x64xf32>
    %56 = arith.divf %54, %55 : vector<2x64xf32>
    %57 = vector.extract_strided_slice %44 {offsets = [0, 128], sizes = [2, 64], strides = [1, 1]} : vector<2x256xf32> to vector<2x64xf32>
    %58 = math.tanh %57 : vector<2x64xf32>
    %59 = vector.extract_strided_slice %44 {offsets = [0, 192], sizes = [2, 64], strides = [1, 1]} : vector<2x256xf32> to vector<2x64xf32>
    %60 = arith.negf %59 : vector<2x64xf32>
    %61 = math.exp %60 : vector<2x64xf32>
    %cst_22 = arith.constant 1.000000e+00 : f32
    %62 = vector.broadcast %cst_22 : f32 to vector<2x64xf32>
    %63 = arith.addf %62, %61 : vector<2x64xf32>
    %64 = arith.divf %62, %63 : vector<2x64xf32>
    %65 = arith.mulf %56, %35 : vector<2x64xf32>
    %66 = arith.mulf %50, %58 : vector<2x64xf32>
    %67 = arith.addf %65, %66 : vector<2x64xf32>
    %68 = math.tanh %67 : vector<2x64xf32>
    %69 = arith.mulf %64, %68 : vector<2x64xf32>
    %70 = vector.extract_strided_slice %1 {offsets = [0, 0], sizes = [2, 1], strides = [1, 1]} : vector<2x8xf32> to vector<2x1xf32>
    %71 = vector.extract_strided_slice %1 {offsets = [0, 7], sizes = [2, 1], strides = [1, 1]} : vector<2x8xf32> to vector<2x1xf32>
    %72 = vector.shape_cast %32 : vector<1x64xi1> to vector<1x64xi1>
    %73 = vector.broadcast %72 : vector<1x64xi1> to vector<2x64xi1>
    %74 = vector.shape_cast %70 : vector<2x1xf32> to vector<2x1xf32>
    %75 = vector.broadcast %74 : vector<2x1xf32> to vector<2x64xf32>
    %76 = vector.shape_cast %71 : vector<2x1xf32> to vector<2x1xf32>
    %77 = vector.broadcast %76 : vector<2x1xf32> to vector<2x64xf32>
    %78 = arith.select %73, %75, %77 : vector<2x64xi1>, vector<2x64xf32>
    %79 = arith.mulf %78, %67 : vector<2x64xf32>
    %cst_23 = arith.constant 1.000000e+00 : f32
    %80 = vector.broadcast %cst_23 : f32 to vector<2x64xf32>
    %81 = arith.subf %80, %78 : vector<2x64xf32>
    %82 = arith.mulf %81, %35 : vector<2x64xf32>
    %83 = arith.addf %79, %82 : vector<2x64xf32>
    %84 = arith.mulf %78, %69 : vector<2x64xf32>
    %cst_24 = arith.constant 1.000000e+00 : f32
    %85 = vector.broadcast %cst_24 : f32 to vector<2x64xf32>
    %86 = arith.subf %85, %78 : vector<2x64xf32>
    %87 = arith.mulf %86, %34 : vector<2x64xf32>
    %88 = arith.addf %84, %87 : vector<2x64xf32>
    %89 = vector.extract_strided_slice %88 {offsets = [0, 0], sizes = [2, 16], strides = [1, 1]} : vector<2x64xf32> to vector<2x16xf32>
    %90 = vector.broadcast %2 : f32 to vector<2x16xf32>
    %91 = arith.mulf %89, %90 : vector<2x16xf32>
    %92 = vector.extract_strided_slice %88 {offsets = [0, 16], sizes = [2, 16], strides = [1, 1]} : vector<2x64xf32> to vector<2x16xf32>
    %93 = vector.broadcast %3 : f32 to vector<2x16xf32>
    %94 = arith.mulf %92, %93 : vector<2x16xf32>
    %95 = arith.addf %91, %94 : vector<2x16xf32>
    %96 = vector.extract_strided_slice %1 {offsets = [0, 0], sizes = [2, 1], strides = [1, 1]} : vector<2x8xf32> to vector<2x1xf32>
    %97 = vector.broadcast %96 : vector<2x1xf32> to vector<2x16xf32>
    %98 = arith.mulf %95, %97 : vector<2x16xf32>
    %99 = vector.extract_strided_slice %88 {offsets = [0, 32], sizes = [2, 16], strides = [1, 1]} : vector<2x64xf32> to vector<2x16xf32>
    %100 = vector.broadcast %2 : f32 to vector<2x16xf32>
    %101 = arith.mulf %99, %100 : vector<2x16xf32>
    %102 = vector.extract_strided_slice %88 {offsets = [0, 48], sizes = [2, 16], strides = [1, 1]} : vector<2x64xf32> to vector<2x16xf32>
    %103 = vector.broadcast %3 : f32 to vector<2x16xf32>
    %104 = arith.mulf %102, %103 : vector<2x16xf32>
    %105 = arith.addf %101, %104 : vector<2x16xf32>
    %c0_25 = arith.constant 0 : index
    %c0_26 = arith.constant 0 : index
    %c0_27 = arith.constant 0 : index
    %106 = vector.load %arg12[%c0_25, %c0_26, %c0_27] : memref<2x8x32xf32, #tpu.memory_space<vmem>>, vector<2x1x16xf32>
    %107 = vector.shape_cast %106 : vector<2x1x16xf32> to vector<2x16xf32>
    %108 = vector.shape_cast %98 : vector<2x16xf32> to vector<2x1x16xf32>
    tpu.vector_store %arg12[%c0_25, %c0_26, %c0_27], %108 {strides = array<i32>} : memref<2x8x32xf32, #tpu.memory_space<vmem>>, vector<2x1x16xf32>,
    %c0_28 = arith.constant 0 : index
    %c7 = arith.constant 7 : index
    %c16 = arith.constant 16 : index
    %109 = vector.load %arg12[%c0_28, %c7, %c16] : memref<2x8x32xf32, #tpu.memory_space<vmem>>, vector<2x1x16xf32>
    %110 = vector.shape_cast %109 : vector<2x1x16xf32> to vector<2x16xf32>
    %111 = vector.shape_cast %105 : vector<2x16xf32> to vector<2x1x16xf32>
    tpu.vector_store %arg12[%c0_28, %c7, %c16], %111 {strides = array<i32>} : memref<2x8x32xf32, #tpu.memory_space<vmem>>, vector<2x1x16xf32>,
    %112 = vector.extract_strided_slice %10 {offsets = [0, 1, 0], sizes = [2, 1, 256], strides = [1, 1, 1]} : vector<2x8x256xf32> to vector<2x1x256xf32>
    %113 = vector.shape_cast %112 : vector<2x1x256xf32> to vector<2x256xf32>
    %114 = vector.extract_strided_slice %10 {offsets = [0, 6, 0], sizes = [2, 1, 256], strides = [1, 1, 1]} : vector<2x8x256xf32> to vector<2x1x256xf32>
    %115 = vector.shape_cast %114 : vector<2x1x256xf32> to vector<2x256xf32>
    %116 = vector.shape_cast %29 : vector<1x256xi1> to vector<1x256xi1>
    %117 = vector.broadcast %116 : vector<1x256xi1> to vector<2x256xi1>
    %118 = arith.select %117, %113, %115 : vector<2x256xi1>, vector<2x256xf32>
    %cst_29 = arith.constant dense<0.000000e+00> : vector<2x256xf32>
    %119 = tpu.matmul %88, %33, %cst_29 {dimension_numbers = #tpu.dot_dimension_numbers<[1], [0], [0], [1], [0, 0, 1, 1], [], []>} : vector<2x64xf32>, vector<64x256xf32>, vector<2x256xf32> -> vector<2x256xf32>
    %120 = arith.addf %118, %119 : vector<2x256xf32>
    %121 = vector.extract_strided_slice %120 {offsets = [0, 0], sizes = [2, 64], strides = [1, 1]} : vector<2x256xf32> to vector<2x64xf32>
    %122 = arith.negf %121 : vector<2x64xf32>
    %123 = math.exp %122 : vector<2x64xf32>
    %cst_30 = arith.constant 1.000000e+00 : f32
    %124 = vector.broadcast %cst_30 : f32 to vector<2x64xf32>
    %125 = arith.addf %124, %123 : vector<2x64xf32>
    %126 = arith.divf %124, %125 : vector<2x64xf32>
    %127 = vector.extract_strided_slice %120 {offsets = [0, 64], sizes = [2, 64], strides = [1, 1]} : vector<2x256xf32> to vector<2x64xf32>
    %128 = arith.negf %127 : vector<2x64xf32>
    %129 = math.exp %128 : vector<2x64xf32>
    %cst_31 = arith.constant 1.000000e+00 : f32
    %130 = vector.broadcast %cst_31 : f32 to vector<2x64xf32>
    %131 = arith.addf %130, %129 : vector<2x64xf32>
    %132 = arith.divf %130, %131 : vector<2x64xf32>
    %133 = vector.extract_strided_slice %120 {offsets = [0, 128], sizes = [2, 64], strides = [1, 1]} : vector<2x256xf32> to vector<2x64xf32>
    %134 = math.tanh %133 : vector<2x64xf32>
    %135 = vector.extract_strided_slice %120 {offsets = [0, 192], sizes = [2, 64], strides = [1, 1]} : vector<2x256xf32> to vector<2x64xf32>
    %136 = arith.negf %135 : vector<2x64xf32>
    %137 = math.exp %136 : vector<2x64xf32>
    %cst_32 = arith.constant 1.000000e+00 : f32
    %138 = vector.broadcast %cst_32 : f32 to vector<2x64xf32>
    %139 = arith.addf %138, %137 : vector<2x64xf32>
    %140 = arith.divf %138, %139 : vector<2x64xf32>
    %141 = arith.mulf %132, %83 : vector<2x64xf32>
    %142 = arith.mulf %126, %134 : vector<2x64xf32>
    %143 = arith.addf %141, %142 : vector<2x64xf32>
    %144 = math.tanh %143 : vector<2x64xf32>
    %145 = arith.mulf %140, %144 : vector<2x64xf32>
    %146 = vector.extract_strided_slice %1 {offsets = [0, 1], sizes = [2, 1], strides = [1, 1]} : vector<2x8xf32> to vector<2x1xf32>
    %147 = vector.extract_strided_slice %1 {offsets = [0, 6], sizes = [2, 1], strides = [1, 1]} : vector<2x8xf32> to vector<2x1xf32>
    %148 = vector.shape_cast %32 : vector<1x64xi1> to vector<1x64xi1>
    %149 = vector.broadcast %148 : vector<1x64xi1> to vector<2x64xi1>
    %150 = vector.shape_cast %146 : vector<2x1xf32> to vector<2x1xf32>
    %151 = vector.broadcast %150 : vector<2x1xf32> to vector<2x64xf32>
    %152 = vector.shape_cast %147 : vector<2x1xf32> to vector<2x1xf32>
    %153 = vector.broadcast %152 : vector<2x1xf32> to vector<2x64xf32>
    %154 = arith.select %149, %151, %153 : vector<2x64xi1>, vector<2x64xf32>
    %155 = arith.mulf %154, %143 : vector<2x64xf32>
    %cst_33 = arith.constant 1.000000e+00 : f32
    %156 = vector.broadcast %cst_33 : f32 to vector<2x64xf32>
    %157 = arith.subf %156, %154 : vector<2x64xf32>
    %158 = arith.mulf %157, %83 : vector<2x64xf32>
    %159 = arith.addf %155, %158 : vector<2x64xf32>
    %160 = arith.mulf %154, %145 : vector<2x64xf32>
    %cst_34 = arith.constant 1.000000e+00 : f32
    %161 = vector.broadcast %cst_34 : f32 to vector<2x64xf32>
    %162 = arith.subf %161, %154 : vector<2x64xf32>
    %163 = arith.mulf %162, %88 : vector<2x64xf32>
    %164 = arith.addf %160, %163 : vector<2x64xf32>
    %165 = vector.extract_strided_slice %164 {offsets = [0, 0], sizes = [2, 16], strides = [1, 1]} : vector<2x64xf32> to vector<2x16xf32>
    %166 = vector.broadcast %2 : f32 to vector<2x16xf32>
    %167 = arith.mulf %165, %166 : vector<2x16xf32>
    %168 = vector.extract_strided_slice %164 {offsets = [0, 16], sizes = [2, 16], strides = [1, 1]} : vector<2x64xf32> to vector<2x16xf32>
    %169 = vector.broadcast %3 : f32 to vector<2x16xf32>
    %170 = arith.mulf %168, %169 : vector<2x16xf32>
    %171 = arith.addf %167, %170 : vector<2x16xf32>
    %172 = vector.extract_strided_slice %1 {offsets = [0, 1], sizes = [2, 1], strides = [1, 1]} : vector<2x8xf32> to vector<2x1xf32>
    %173 = vector.broadcast %172 : vector<2x1xf32> to vector<2x16xf32>
    %174 = arith.mulf %171, %173 : vector<2x16xf32>
    %175 = vector.extract_strided_slice %164 {offsets = [0, 32], sizes = [2, 16], strides = [1, 1]} : vector<2x64xf32> to vector<2x16xf32>
    %176 = vector.broadcast %2 : f32 to vector<2x16xf32>
    %177 = arith.mulf %175, %176 : vector<2x16xf32>
    %178 = vector.extract_strided_slice %164 {offsets = [0, 48], sizes = [2, 16], strides = [1, 1]} : vector<2x64xf32> to vector<2x16xf32>
    %179 = vector.broadcast %3 : f32 to vector<2x16xf32>
    %180 = arith.mulf %178, %179 : vector<2x16xf32>
    %181 = arith.addf %177, %180 : vector<2x16xf32>
    %c0_35 = arith.constant 0 : index
    %c1 = arith.constant 1 : index
    %c0_36 = arith.constant 0 : index
    %182 = vector.load %arg12[%c0_35, %c1, %c0_36] : memref<2x8x32xf32, #tpu.memory_space<vmem>>, vector<2x1x16xf32>
    %183 = vector.shape_cast %182 : vector<2x1x16xf32> to vector<2x16xf32>
    %184 = vector.shape_cast %174 : vector<2x16xf32> to vector<2x1x16xf32>
    tpu.vector_store %arg12[%c0_35, %c1, %c0_36], %184 {strides = array<i32>} : memref<2x8x32xf32, #tpu.memory_space<vmem>>, vector<2x1x16xf32>,
    %c0_37 = arith.constant 0 : index
    %c6 = arith.constant 6 : index
    %c16_38 = arith.constant 16 : index
    %185 = vector.load %arg12[%c0_37, %c6, %c16_38] : memref<2x8x32xf32, #tpu.memory_space<vmem>>, vector<2x1x16xf32>
    %186 = vector.shape_cast %185 : vector<2x1x16xf32> to vector<2x16xf32>
    %187 = vector.shape_cast %181 : vector<2x16xf32> to vector<2x1x16xf32>
    tpu.vector_store %arg12[%c0_37, %c6, %c16_38], %187 {strides = array<i32>} : memref<2x8x32xf32, #tpu.memory_space<vmem>>, vector<2x1x16xf32>,
    %188 = vector.extract_strided_slice %10 {offsets = [0, 2, 0], sizes = [2, 1, 256], strides = [1, 1, 1]} : vector<2x8x256xf32> to vector<2x1x256xf32>
    %189 = vector.shape_cast %188 : vector<2x1x256xf32> to vector<2x256xf32>
    %190 = vector.extract_strided_slice %10 {offsets = [0, 5, 0], sizes = [2, 1, 256], strides = [1, 1, 1]} : vector<2x8x256xf32> to vector<2x1x256xf32>
    %191 = vector.shape_cast %190 : vector<2x1x256xf32> to vector<2x256xf32>
    %192 = vector.shape_cast %29 : vector<1x256xi1> to vector<1x256xi1>
    %193 = vector.broadcast %192 : vector<1x256xi1> to vector<2x256xi1>
    %194 = arith.select %193, %189, %191 : vector<2x256xi1>, vector<2x256xf32>
    %cst_39 = arith.constant dense<0.000000e+00> : vector<2x256xf32>
    %195 = tpu.matmul %164, %33, %cst_39 {dimension_numbers = #tpu.dot_dimension_numbers<[1], [0], [0], [1], [0, 0, 1, 1], [], []>} : vector<2x64xf32>, vector<64x256xf32>, vector<2x256xf32> -> vector<2x256xf32>
    %196 = arith.addf %194, %195 : vector<2x256xf32>
    %197 = vector.extract_strided_slice %196 {offsets = [0, 0], sizes = [2, 64], strides = [1, 1]} : vector<2x256xf32> to vector<2x64xf32>
    %198 = arith.negf %197 : vector<2x64xf32>
    %199 = math.exp %198 : vector<2x64xf32>
    %cst_40 = arith.constant 1.000000e+00 : f32
    %200 = vector.broadcast %cst_40 : f32 to vector<2x64xf32>
    %201 = arith.addf %200, %199 : vector<2x64xf32>
    %202 = arith.divf %200, %201 : vector<2x64xf32>
    %203 = vector.extract_strided_slice %196 {offsets = [0, 64], sizes = [2, 64], strides = [1, 1]} : vector<2x256xf32> to vector<2x64xf32>
    %204 = arith.negf %203 : vector<2x64xf32>
    %205 = math.exp %204 : vector<2x64xf32>
    %cst_41 = arith.constant 1.000000e+00 : f32
    %206 = vector.broadcast %cst_41 : f32 to vector<2x64xf32>
    %207 = arith.addf %206, %205 : vector<2x64xf32>
    %208 = arith.divf %206, %207 : vector<2x64xf32>
    %209 = vector.extract_strided_slice %196 {offsets = [0, 128], sizes = [2, 64], strides = [1, 1]} : vector<2x256xf32> to vector<2x64xf32>
    %210 = math.tanh %209 : vector<2x64xf32>
    %211 = vector.extract_strided_slice %196 {offsets = [0, 192], sizes = [2, 64], strides = [1, 1]} : vector<2x256xf32> to vector<2x64xf32>
    %212 = arith.negf %211 : vector<2x64xf32>
    %213 = math.exp %212 : vector<2x64xf32>
    %cst_42 = arith.constant 1.000000e+00 : f32
    %214 = vector.broadcast %cst_42 : f32 to vector<2x64xf32>
    %215 = arith.addf %214, %213 : vector<2x64xf32>
    %216 = arith.divf %214, %215 : vector<2x64xf32>
    %217 = arith.mulf %208, %159 : vector<2x64xf32>
    %218 = arith.mulf %202, %210 : vector<2x64xf32>
    %219 = arith.addf %217, %218 : vector<2x64xf32>
    %220 = math.tanh %219 : vector<2x64xf32>
    %221 = arith.mulf %216, %220 : vector<2x64xf32>
    %222 = vector.extract_strided_slice %1 {offsets = [0, 2], sizes = [2, 1], strides = [1, 1]} : vector<2x8xf32> to vector<2x1xf32>
    %223 = vector.extract_strided_slice %1 {offsets = [0, 5], sizes = [2, 1], strides = [1, 1]} : vector<2x8xf32> to vector<2x1xf32>
    %224 = vector.shape_cast %32 : vector<1x64xi1> to vector<1x64xi1>
    %225 = vector.broadcast %224 : vector<1x64xi1> to vector<2x64xi1>
    %226 = vector.shape_cast %222 : vector<2x1xf32> to vector<2x1xf32>
    %227 = vector.broadcast %226 : vector<2x1xf32> to vector<2x64xf32>
    %228 = vector.shape_cast %223 : vector<2x1xf32> to vector<2x1xf32>
    %229 = vector.broadcast %228 : vector<2x1xf32> to vector<2x64xf32>
    %230 = arith.select %225, %227, %229 : vector<2x64xi1>, vector<2x64xf32>
    %231 = arith.mulf %230, %219 : vector<2x64xf32>
    %cst_43 = arith.constant 1.000000e+00 : f32
    %232 = vector.broadcast %cst_43 : f32 to vector<2x64xf32>
    %233 = arith.subf %232, %230 : vector<2x64xf32>
    %234 = arith.mulf %233, %159 : vector<2x64xf32>
    %235 = arith.addf %231, %234 : vector<2x64xf32>
    %236 = arith.mulf %230, %221 : vector<2x64xf32>
    %cst_44 = arith.constant 1.000000e+00 : f32
    %237 = vector.broadcast %cst_44 : f32 to vector<2x64xf32>
    %238 = arith.subf %237, %230 : vector<2x64xf32>
    %239 = arith.mulf %238, %164 : vector<2x64xf32>
    %240 = arith.addf %236, %239 : vector<2x64xf32>
    %241 = vector.extract_strided_slice %240 {offsets = [0, 0], sizes = [2, 16], strides = [1, 1]} : vector<2x64xf32> to vector<2x16xf32>
    %242 = vector.broadcast %2 : f32 to vector<2x16xf32>
    %243 = arith.mulf %241, %242 : vector<2x16xf32>
    %244 = vector.extract_strided_slice %240 {offsets = [0, 16], sizes = [2, 16], strides = [1, 1]} : vector<2x64xf32> to vector<2x16xf32>
    %245 = vector.broadcast %3 : f32 to vector<2x16xf32>
    %246 = arith.mulf %244, %245 : vector<2x16xf32>
    %247 = arith.addf %243, %246 : vector<2x16xf32>
    %248 = vector.extract_strided_slice %1 {offsets = [0, 2], sizes = [2, 1], strides = [1, 1]} : vector<2x8xf32> to vector<2x1xf32>
    %249 = vector.broadcast %248 : vector<2x1xf32> to vector<2x16xf32>
    %250 = arith.mulf %247, %249 : vector<2x16xf32>
    %251 = vector.extract_strided_slice %240 {offsets = [0, 32], sizes = [2, 16], strides = [1, 1]} : vector<2x64xf32> to vector<2x16xf32>
    %252 = vector.broadcast %2 : f32 to vector<2x16xf32>
    %253 = arith.mulf %251, %252 : vector<2x16xf32>
    %254 = vector.extract_strided_slice %240 {offsets = [0, 48], sizes = [2, 16], strides = [1, 1]} : vector<2x64xf32> to vector<2x16xf32>
    %255 = vector.broadcast %3 : f32 to vector<2x16xf32>
    %256 = arith.mulf %254, %255 : vector<2x16xf32>
    %257 = arith.addf %253, %256 : vector<2x16xf32>
    %c0_45 = arith.constant 0 : index
    %c2 = arith.constant 2 : index
    %c0_46 = arith.constant 0 : index
    %258 = vector.load %arg12[%c0_45, %c2, %c0_46] : memref<2x8x32xf32, #tpu.memory_space<vmem>>, vector<2x1x16xf32>
    %259 = vector.shape_cast %258 : vector<2x1x16xf32> to vector<2x16xf32>
    %260 = vector.shape_cast %250 : vector<2x16xf32> to vector<2x1x16xf32>
    tpu.vector_store %arg12[%c0_45, %c2, %c0_46], %260 {strides = array<i32>} : memref<2x8x32xf32, #tpu.memory_space<vmem>>, vector<2x1x16xf32>,
    %c0_47 = arith.constant 0 : index
    %c5 = arith.constant 5 : index
    %c16_48 = arith.constant 16 : index
    %261 = vector.load %arg12[%c0_47, %c5, %c16_48] : memref<2x8x32xf32, #tpu.memory_space<vmem>>, vector<2x1x16xf32>
    %262 = vector.shape_cast %261 : vector<2x1x16xf32> to vector<2x16xf32>
    %263 = vector.shape_cast %257 : vector<2x16xf32> to vector<2x1x16xf32>
    tpu.vector_store %arg12[%c0_47, %c5, %c16_48], %263 {strides = array<i32>} : memref<2x8x32xf32, #tpu.memory_space<vmem>>, vector<2x1x16xf32>,
    %264 = vector.extract_strided_slice %10 {offsets = [0, 3, 0], sizes = [2, 1, 256], strides = [1, 1, 1]} : vector<2x8x256xf32> to vector<2x1x256xf32>
    %265 = vector.shape_cast %264 : vector<2x1x256xf32> to vector<2x256xf32>
    %266 = vector.extract_strided_slice %10 {offsets = [0, 4, 0], sizes = [2, 1, 256], strides = [1, 1, 1]} : vector<2x8x256xf32> to vector<2x1x256xf32>
    %267 = vector.shape_cast %266 : vector<2x1x256xf32> to vector<2x256xf32>
    %268 = vector.shape_cast %29 : vector<1x256xi1> to vector<1x256xi1>
    %269 = vector.broadcast %268 : vector<1x256xi1> to vector<2x256xi1>
    %270 = arith.select %269, %265, %267 : vector<2x256xi1>, vector<2x256xf32>
    %cst_49 = arith.constant dense<0.000000e+00> : vector<2x256xf32>
    %271 = tpu.matmul %240, %33, %cst_49 {dimension_numbers = #tpu.dot_dimension_numbers<[1], [0], [0], [1], [0, 0, 1, 1], [], []>} : vector<2x64xf32>, vector<64x256xf32>, vector<2x256xf32> -> vector<2x256xf32>
    %272 = arith.addf %270, %271 : vector<2x256xf32>
    %273 = vector.extract_strided_slice %272 {offsets = [0, 0], sizes = [2, 64], strides = [1, 1]} : vector<2x256xf32> to vector<2x64xf32>
    %274 = arith.negf %273 : vector<2x64xf32>
    %275 = math.exp %274 : vector<2x64xf32>
    %cst_50 = arith.constant 1.000000e+00 : f32
    %276 = vector.broadcast %cst_50 : f32 to vector<2x64xf32>
    %277 = arith.addf %276, %275 : vector<2x64xf32>
    %278 = arith.divf %276, %277 : vector<2x64xf32>
    %279 = vector.extract_strided_slice %272 {offsets = [0, 64], sizes = [2, 64], strides = [1, 1]} : vector<2x256xf32> to vector<2x64xf32>
    %280 = arith.negf %279 : vector<2x64xf32>
    %281 = math.exp %280 : vector<2x64xf32>
    %cst_51 = arith.constant 1.000000e+00 : f32
    %282 = vector.broadcast %cst_51 : f32 to vector<2x64xf32>
    %283 = arith.addf %282, %281 : vector<2x64xf32>
    %284 = arith.divf %282, %283 : vector<2x64xf32>
    %285 = vector.extract_strided_slice %272 {offsets = [0, 128], sizes = [2, 64], strides = [1, 1]} : vector<2x256xf32> to vector<2x64xf32>
    %286 = math.tanh %285 : vector<2x64xf32>
    %287 = vector.extract_strided_slice %272 {offsets = [0, 192], sizes = [2, 64], strides = [1, 1]} : vector<2x256xf32> to vector<2x64xf32>
    %288 = arith.negf %287 : vector<2x64xf32>
    %289 = math.exp %288 : vector<2x64xf32>
    %cst_52 = arith.constant 1.000000e+00 : f32
    %290 = vector.broadcast %cst_52 : f32 to vector<2x64xf32>
    %291 = arith.addf %290, %289 : vector<2x64xf32>
    %292 = arith.divf %290, %291 : vector<2x64xf32>
    %293 = arith.mulf %284, %235 : vector<2x64xf32>
    %294 = arith.mulf %278, %286 : vector<2x64xf32>
    %295 = arith.addf %293, %294 : vector<2x64xf32>
    %296 = math.tanh %295 : vector<2x64xf32>
    %297 = arith.mulf %292, %296 : vector<2x64xf32>
    %298 = vector.extract_strided_slice %1 {offsets = [0, 3], sizes = [2, 1], strides = [1, 1]} : vector<2x8xf32> to vector<2x1xf32>
    %299 = vector.extract_strided_slice %1 {offsets = [0, 4], sizes = [2, 1], strides = [1, 1]} : vector<2x8xf32> to vector<2x1xf32>
    %300 = vector.shape_cast %32 : vector<1x64xi1> to vector<1x64xi1>
    %301 = vector.broadcast %300 : vector<1x64xi1> to vector<2x64xi1>
    %302 = vector.shape_cast %298 : vector<2x1xf32> to vector<2x1xf32>
    %303 = vector.broadcast %302 : vector<2x1xf32> to vector<2x64xf32>
    %304 = vector.shape_cast %299 : vector<2x1xf32> to vector<2x1xf32>
    %305 = vector.broadcast %304 : vector<2x1xf32> to vector<2x64xf32>
    %306 = arith.select %301, %303, %305 : vector<2x64xi1>, vector<2x64xf32>
    %307 = arith.mulf %306, %295 : vector<2x64xf32>
    %cst_53 = arith.constant 1.000000e+00 : f32
    %308 = vector.broadcast %cst_53 : f32 to vector<2x64xf32>
    %309 = arith.subf %308, %306 : vector<2x64xf32>
    %310 = arith.mulf %309, %235 : vector<2x64xf32>
    %311 = arith.addf %307, %310 : vector<2x64xf32>
    %312 = arith.mulf %306, %297 : vector<2x64xf32>
    %cst_54 = arith.constant 1.000000e+00 : f32
    %313 = vector.broadcast %cst_54 : f32 to vector<2x64xf32>
    %314 = arith.subf %313, %306 : vector<2x64xf32>
    %315 = arith.mulf %314, %240 : vector<2x64xf32>
    %316 = arith.addf %312, %315 : vector<2x64xf32>
    %317 = vector.extract_strided_slice %316 {offsets = [0, 0], sizes = [2, 16], strides = [1, 1]} : vector<2x64xf32> to vector<2x16xf32>
    %318 = vector.broadcast %2 : f32 to vector<2x16xf32>
    %319 = arith.mulf %317, %318 : vector<2x16xf32>
    %320 = vector.extract_strided_slice %316 {offsets = [0, 16], sizes = [2, 16], strides = [1, 1]} : vector<2x64xf32> to vector<2x16xf32>
    %321 = vector.broadcast %3 : f32 to vector<2x16xf32>
    %322 = arith.mulf %320, %321 : vector<2x16xf32>
    %323 = arith.addf %319, %322 : vector<2x16xf32>
    %324 = vector.extract_strided_slice %1 {offsets = [0, 3], sizes = [2, 1], strides = [1, 1]} : vector<2x8xf32> to vector<2x1xf32>
    %325 = vector.broadcast %324 : vector<2x1xf32> to vector<2x16xf32>
    %326 = arith.mulf %323, %325 : vector<2x16xf32>
    %327 = vector.extract_strided_slice %316 {offsets = [0, 32], sizes = [2, 16], strides = [1, 1]} : vector<2x64xf32> to vector<2x16xf32>
    %328 = vector.broadcast %2 : f32 to vector<2x16xf32>
    %329 = arith.mulf %327, %328 : vector<2x16xf32>
    %330 = vector.extract_strided_slice %316 {offsets = [0, 48], sizes = [2, 16], strides = [1, 1]} : vector<2x64xf32> to vector<2x16xf32>
    %331 = vector.broadcast %3 : f32 to vector<2x16xf32>
    %332 = arith.mulf %330, %331 : vector<2x16xf32>
    %333 = arith.addf %329, %332 : vector<2x16xf32>
    %c0_55 = arith.constant 0 : index
    %c3 = arith.constant 3 : index
    %c0_56 = arith.constant 0 : index
    %334 = vector.load %arg12[%c0_55, %c3, %c0_56] : memref<2x8x32xf32, #tpu.memory_space<vmem>>, vector<2x1x16xf32>
    %335 = vector.shape_cast %334 : vector<2x1x16xf32> to vector<2x16xf32>
    %336 = vector.shape_cast %326 : vector<2x16xf32> to vector<2x1x16xf32>
    tpu.vector_store %arg12[%c0_55, %c3, %c0_56], %336 {strides = array<i32>} : memref<2x8x32xf32, #tpu.memory_space<vmem>>, vector<2x1x16xf32>,
    %c0_57 = arith.constant 0 : index
    %c4 = arith.constant 4 : index
    %c16_58 = arith.constant 16 : index
    %337 = vector.load %arg12[%c0_57, %c4, %c16_58] : memref<2x8x32xf32, #tpu.memory_space<vmem>>, vector<2x1x16xf32>
    %338 = vector.shape_cast %337 : vector<2x1x16xf32> to vector<2x16xf32>
    %339 = vector.shape_cast %333 : vector<2x16xf32> to vector<2x1x16xf32>
    tpu.vector_store %arg12[%c0_57, %c4, %c16_58], %339 {strides = array<i32>} : memref<2x8x32xf32, #tpu.memory_space<vmem>>, vector<2x1x16xf32>,
    %340 = vector.extract_strided_slice %10 {offsets = [0, 4, 0], sizes = [2, 1, 256], strides = [1, 1, 1]} : vector<2x8x256xf32> to vector<2x1x256xf32>
    %341 = vector.shape_cast %340 : vector<2x1x256xf32> to vector<2x256xf32>
    %342 = vector.extract_strided_slice %10 {offsets = [0, 3, 0], sizes = [2, 1, 256], strides = [1, 1, 1]} : vector<2x8x256xf32> to vector<2x1x256xf32>
    %343 = vector.shape_cast %342 : vector<2x1x256xf32> to vector<2x256xf32>
    %344 = vector.shape_cast %29 : vector<1x256xi1> to vector<1x256xi1>
    %345 = vector.broadcast %344 : vector<1x256xi1> to vector<2x256xi1>
    %346 = arith.select %345, %341, %343 : vector<2x256xi1>, vector<2x256xf32>
    %cst_59 = arith.constant dense<0.000000e+00> : vector<2x256xf32>
    %347 = tpu.matmul %316, %33, %cst_59 {dimension_numbers = #tpu.dot_dimension_numbers<[1], [0], [0], [1], [0, 0, 1, 1], [], []>} : vector<2x64xf32>, vector<64x256xf32>, vector<2x256xf32> -> vector<2x256xf32>
    %348 = arith.addf %346, %347 : vector<2x256xf32>
    %349 = vector.extract_strided_slice %348 {offsets = [0, 0], sizes = [2, 64], strides = [1, 1]} : vector<2x256xf32> to vector<2x64xf32>
    %350 = arith.negf %349 : vector<2x64xf32>
    %351 = math.exp %350 : vector<2x64xf32>
    %cst_60 = arith.constant 1.000000e+00 : f32
    %352 = vector.broadcast %cst_60 : f32 to vector<2x64xf32>
    %353 = arith.addf %352, %351 : vector<2x64xf32>
    %354 = arith.divf %352, %353 : vector<2x64xf32>
    %355 = vector.extract_strided_slice %348 {offsets = [0, 64], sizes = [2, 64], strides = [1, 1]} : vector<2x256xf32> to vector<2x64xf32>
    %356 = arith.negf %355 : vector<2x64xf32>
    %357 = math.exp %356 : vector<2x64xf32>
    %cst_61 = arith.constant 1.000000e+00 : f32
    %358 = vector.broadcast %cst_61 : f32 to vector<2x64xf32>
    %359 = arith.addf %358, %357 : vector<2x64xf32>
    %360 = arith.divf %358, %359 : vector<2x64xf32>
    %361 = vector.extract_strided_slice %348 {offsets = [0, 128], sizes = [2, 64], strides = [1, 1]} : vector<2x256xf32> to vector<2x64xf32>
    %362 = math.tanh %361 : vector<2x64xf32>
    %363 = vector.extract_strided_slice %348 {offsets = [0, 192], sizes = [2, 64], strides = [1, 1]} : vector<2x256xf32> to vector<2x64xf32>
    %364 = arith.negf %363 : vector<2x64xf32>
    %365 = math.exp %364 : vector<2x64xf32>
    %cst_62 = arith.constant 1.000000e+00 : f32
    %366 = vector.broadcast %cst_62 : f32 to vector<2x64xf32>
    %367 = arith.addf %366, %365 : vector<2x64xf32>
    %368 = arith.divf %366, %367 : vector<2x64xf32>
    %369 = arith.mulf %360, %311 : vector<2x64xf32>
    %370 = arith.mulf %354, %362 : vector<2x64xf32>
    %371 = arith.addf %369, %370 : vector<2x64xf32>
    %372 = math.tanh %371 : vector<2x64xf32>
    %373 = arith.mulf %368, %372 : vector<2x64xf32>
    %374 = vector.extract_strided_slice %1 {offsets = [0, 4], sizes = [2, 1], strides = [1, 1]} : vector<2x8xf32> to vector<2x1xf32>
    %375 = vector.extract_strided_slice %1 {offsets = [0, 3], sizes = [2, 1], strides = [1, 1]} : vector<2x8xf32> to vector<2x1xf32>
    %376 = vector.shape_cast %32 : vector<1x64xi1> to vector<1x64xi1>
    %377 = vector.broadcast %376 : vector<1x64xi1> to vector<2x64xi1>
    %378 = vector.shape_cast %374 : vector<2x1xf32> to vector<2x1xf32>
    %379 = vector.broadcast %378 : vector<2x1xf32> to vector<2x64xf32>
    %380 = vector.shape_cast %375 : vector<2x1xf32> to vector<2x1xf32>
    %381 = vector.broadcast %380 : vector<2x1xf32> to vector<2x64xf32>
    %382 = arith.select %377, %379, %381 : vector<2x64xi1>, vector<2x64xf32>
    %383 = arith.mulf %382, %371 : vector<2x64xf32>
    %cst_63 = arith.constant 1.000000e+00 : f32
    %384 = vector.broadcast %cst_63 : f32 to vector<2x64xf32>
    %385 = arith.subf %384, %382 : vector<2x64xf32>
    %386 = arith.mulf %385, %311 : vector<2x64xf32>
    %387 = arith.addf %383, %386 : vector<2x64xf32>
    %388 = arith.mulf %382, %373 : vector<2x64xf32>
    %cst_64 = arith.constant 1.000000e+00 : f32
    %389 = vector.broadcast %cst_64 : f32 to vector<2x64xf32>
    %390 = arith.subf %389, %382 : vector<2x64xf32>
    %391 = arith.mulf %390, %316 : vector<2x64xf32>
    %392 = arith.addf %388, %391 : vector<2x64xf32>
    %393 = vector.extract_strided_slice %392 {offsets = [0, 0], sizes = [2, 16], strides = [1, 1]} : vector<2x64xf32> to vector<2x16xf32>
    %394 = vector.broadcast %2 : f32 to vector<2x16xf32>
    %395 = arith.mulf %393, %394 : vector<2x16xf32>
    %396 = vector.extract_strided_slice %392 {offsets = [0, 16], sizes = [2, 16], strides = [1, 1]} : vector<2x64xf32> to vector<2x16xf32>
    %397 = vector.broadcast %3 : f32 to vector<2x16xf32>
    %398 = arith.mulf %396, %397 : vector<2x16xf32>
    %399 = arith.addf %395, %398 : vector<2x16xf32>
    %400 = vector.extract_strided_slice %1 {offsets = [0, 4], sizes = [2, 1], strides = [1, 1]} : vector<2x8xf32> to vector<2x1xf32>
    %401 = vector.broadcast %400 : vector<2x1xf32> to vector<2x16xf32>
    %402 = arith.mulf %399, %401 : vector<2x16xf32>
    %403 = vector.extract_strided_slice %392 {offsets = [0, 32], sizes = [2, 16], strides = [1, 1]} : vector<2x64xf32> to vector<2x16xf32>
    %404 = vector.broadcast %2 : f32 to vector<2x16xf32>
    %405 = arith.mulf %403, %404 : vector<2x16xf32>
    %406 = vector.extract_strided_slice %392 {offsets = [0, 48], sizes = [2, 16], strides = [1, 1]} : vector<2x64xf32> to vector<2x16xf32>
    %407 = vector.broadcast %3 : f32 to vector<2x16xf32>
    %408 = arith.mulf %406, %407 : vector<2x16xf32>
    %409 = arith.addf %405, %408 : vector<2x16xf32>
    %c0_65 = arith.constant 0 : index
    %c4_66 = arith.constant 4 : index
    %c0_67 = arith.constant 0 : index
    %410 = vector.load %arg12[%c0_65, %c4_66, %c0_67] : memref<2x8x32xf32, #tpu.memory_space<vmem>>, vector<2x1x16xf32>
    %411 = vector.shape_cast %410 : vector<2x1x16xf32> to vector<2x16xf32>
    %412 = vector.shape_cast %402 : vector<2x16xf32> to vector<2x1x16xf32>
    tpu.vector_store %arg12[%c0_65, %c4_66, %c0_67], %412 {strides = array<i32>} : memref<2x8x32xf32, #tpu.memory_space<vmem>>, vector<2x1x16xf32>,
    %c0_68 = arith.constant 0 : index
    %c3_69 = arith.constant 3 : index
    %c16_70 = arith.constant 16 : index
    %413 = vector.load %arg12[%c0_68, %c3_69, %c16_70] : memref<2x8x32xf32, #tpu.memory_space<vmem>>, vector<2x1x16xf32>
    %414 = vector.shape_cast %413 : vector<2x1x16xf32> to vector<2x16xf32>
    %415 = vector.shape_cast %409 : vector<2x16xf32> to vector<2x1x16xf32>
    tpu.vector_store %arg12[%c0_68, %c3_69, %c16_70], %415 {strides = array<i32>} : memref<2x8x32xf32, #tpu.memory_space<vmem>>, vector<2x1x16xf32>,
    %416 = vector.extract_strided_slice %10 {offsets = [0, 5, 0], sizes = [2, 1, 256], strides = [1, 1, 1]} : vector<2x8x256xf32> to vector<2x1x256xf32>
    %417 = vector.shape_cast %416 : vector<2x1x256xf32> to vector<2x256xf32>
    %418 = vector.extract_strided_slice %10 {offsets = [0, 2, 0], sizes = [2, 1, 256], strides = [1, 1, 1]} : vector<2x8x256xf32> to vector<2x1x256xf32>
    %419 = vector.shape_cast %418 : vector<2x1x256xf32> to vector<2x256xf32>
    %420 = vector.shape_cast %29 : vector<1x256xi1> to vector<1x256xi1>
    %421 = vector.broadcast %420 : vector<1x256xi1> to vector<2x256xi1>
    %422 = arith.select %421, %417, %419 : vector<2x256xi1>, vector<2x256xf32>
    %cst_71 = arith.constant dense<0.000000e+00> : vector<2x256xf32>
    %423 = tpu.matmul %392, %33, %cst_71 {dimension_numbers = #tpu.dot_dimension_numbers<[1], [0], [0], [1], [0, 0, 1, 1], [], []>} : vector<2x64xf32>, vector<64x256xf32>, vector<2x256xf32> -> vector<2x256xf32>
    %424 = arith.addf %422, %423 : vector<2x256xf32>
    %425 = vector.extract_strided_slice %424 {offsets = [0, 0], sizes = [2, 64], strides = [1, 1]} : vector<2x256xf32> to vector<2x64xf32>
    %426 = arith.negf %425 : vector<2x64xf32>
    %427 = math.exp %426 : vector<2x64xf32>
    %cst_72 = arith.constant 1.000000e+00 : f32
    %428 = vector.broadcast %cst_72 : f32 to vector<2x64xf32>
    %429 = arith.addf %428, %427 : vector<2x64xf32>
    %430 = arith.divf %428, %429 : vector<2x64xf32>
    %431 = vector.extract_strided_slice %424 {offsets = [0, 64], sizes = [2, 64], strides = [1, 1]} : vector<2x256xf32> to vector<2x64xf32>
    %432 = arith.negf %431 : vector<2x64xf32>
    %433 = math.exp %432 : vector<2x64xf32>
    %cst_73 = arith.constant 1.000000e+00 : f32
    %434 = vector.broadcast %cst_73 : f32 to vector<2x64xf32>
    %435 = arith.addf %434, %433 : vector<2x64xf32>
    %436 = arith.divf %434, %435 : vector<2x64xf32>
    %437 = vector.extract_strided_slice %424 {offsets = [0, 128], sizes = [2, 64], strides = [1, 1]} : vector<2x256xf32> to vector<2x64xf32>
    %438 = math.tanh %437 : vector<2x64xf32>
    %439 = vector.extract_strided_slice %424 {offsets = [0, 192], sizes = [2, 64], strides = [1, 1]} : vector<2x256xf32> to vector<2x64xf32>
    %440 = arith.negf %439 : vector<2x64xf32>
    %441 = math.exp %440 : vector<2x64xf32>
    %cst_74 = arith.constant 1.000000e+00 : f32
    %442 = vector.broadcast %cst_74 : f32 to vector<2x64xf32>
    %443 = arith.addf %442, %441 : vector<2x64xf32>
    %444 = arith.divf %442, %443 : vector<2x64xf32>
    %445 = arith.mulf %436, %387 : vector<2x64xf32>
    %446 = arith.mulf %430, %438 : vector<2x64xf32>
    %447 = arith.addf %445, %446 : vector<2x64xf32>
    %448 = math.tanh %447 : vector<2x64xf32>
    %449 = arith.mulf %444, %448 : vector<2x64xf32>
    %450 = vector.extract_strided_slice %1 {offsets = [0, 5], sizes = [2, 1], strides = [1, 1]} : vector<2x8xf32> to vector<2x1xf32>
    %451 = vector.extract_strided_slice %1 {offsets = [0, 2], sizes = [2, 1], strides = [1, 1]} : vector<2x8xf32> to vector<2x1xf32>
    %452 = vector.shape_cast %32 : vector<1x64xi1> to vector<1x64xi1>
    %453 = vector.broadcast %452 : vector<1x64xi1> to vector<2x64xi1>
    %454 = vector.shape_cast %450 : vector<2x1xf32> to vector<2x1xf32>
    %455 = vector.broadcast %454 : vector<2x1xf32> to vector<2x64xf32>
    %456 = vector.shape_cast %451 : vector<2x1xf32> to vector<2x1xf32>
    %457 = vector.broadcast %456 : vector<2x1xf32> to vector<2x64xf32>
    %458 = arith.select %453, %455, %457 : vector<2x64xi1>, vector<2x64xf32>
    %459 = arith.mulf %458, %447 : vector<2x64xf32>
    %cst_75 = arith.constant 1.000000e+00 : f32
    %460 = vector.broadcast %cst_75 : f32 to vector<2x64xf32>
    %461 = arith.subf %460, %458 : vector<2x64xf32>
    %462 = arith.mulf %461, %387 : vector<2x64xf32>
    %463 = arith.addf %459, %462 : vector<2x64xf32>
    %464 = arith.mulf %458, %449 : vector<2x64xf32>
    %cst_76 = arith.constant 1.000000e+00 : f32
    %465 = vector.broadcast %cst_76 : f32 to vector<2x64xf32>
    %466 = arith.subf %465, %458 : vector<2x64xf32>
    %467 = arith.mulf %466, %392 : vector<2x64xf32>
    %468 = arith.addf %464, %467 : vector<2x64xf32>
    %469 = vector.extract_strided_slice %468 {offsets = [0, 0], sizes = [2, 16], strides = [1, 1]} : vector<2x64xf32> to vector<2x16xf32>
    %470 = vector.broadcast %2 : f32 to vector<2x16xf32>
    %471 = arith.mulf %469, %470 : vector<2x16xf32>
    %472 = vector.extract_strided_slice %468 {offsets = [0, 16], sizes = [2, 16], strides = [1, 1]} : vector<2x64xf32> to vector<2x16xf32>
    %473 = vector.broadcast %3 : f32 to vector<2x16xf32>
    %474 = arith.mulf %472, %473 : vector<2x16xf32>
    %475 = arith.addf %471, %474 : vector<2x16xf32>
    %476 = vector.extract_strided_slice %1 {offsets = [0, 5], sizes = [2, 1], strides = [1, 1]} : vector<2x8xf32> to vector<2x1xf32>
    %477 = vector.broadcast %476 : vector<2x1xf32> to vector<2x16xf32>
    %478 = arith.mulf %475, %477 : vector<2x16xf32>
    %479 = vector.extract_strided_slice %468 {offsets = [0, 32], sizes = [2, 16], strides = [1, 1]} : vector<2x64xf32> to vector<2x16xf32>
    %480 = vector.broadcast %2 : f32 to vector<2x16xf32>
    %481 = arith.mulf %479, %480 : vector<2x16xf32>
    %482 = vector.extract_strided_slice %468 {offsets = [0, 48], sizes = [2, 16], strides = [1, 1]} : vector<2x64xf32> to vector<2x16xf32>
    %483 = vector.broadcast %3 : f32 to vector<2x16xf32>
    %484 = arith.mulf %482, %483 : vector<2x16xf32>
    %485 = arith.addf %481, %484 : vector<2x16xf32>
    %c0_77 = arith.constant 0 : index
    %c5_78 = arith.constant 5 : index
    %c0_79 = arith.constant 0 : index
    %486 = vector.load %arg12[%c0_77, %c5_78, %c0_79] : memref<2x8x32xf32, #tpu.memory_space<vmem>>, vector<2x1x16xf32>
    %487 = vector.shape_cast %486 : vector<2x1x16xf32> to vector<2x16xf32>
    %488 = vector.shape_cast %478 : vector<2x16xf32> to vector<2x1x16xf32>
    tpu.vector_store %arg12[%c0_77, %c5_78, %c0_79], %488 {strides = array<i32>} : memref<2x8x32xf32, #tpu.memory_space<vmem>>, vector<2x1x16xf32>,
    %c0_80 = arith.constant 0 : index
    %c2_81 = arith.constant 2 : index
    %c16_82 = arith.constant 16 : index
    %489 = vector.load %arg12[%c0_80, %c2_81, %c16_82] : memref<2x8x32xf32, #tpu.memory_space<vmem>>, vector<2x1x16xf32>
    %490 = vector.shape_cast %489 : vector<2x1x16xf32> to vector<2x16xf32>
    %491 = vector.shape_cast %485 : vector<2x16xf32> to vector<2x1x16xf32>
    tpu.vector_store %arg12[%c0_80, %c2_81, %c16_82], %491 {strides = array<i32>} : memref<2x8x32xf32, #tpu.memory_space<vmem>>, vector<2x1x16xf32>,
    %492 = vector.extract_strided_slice %10 {offsets = [0, 6, 0], sizes = [2, 1, 256], strides = [1, 1, 1]} : vector<2x8x256xf32> to vector<2x1x256xf32>
    %493 = vector.shape_cast %492 : vector<2x1x256xf32> to vector<2x256xf32>
    %494 = vector.extract_strided_slice %10 {offsets = [0, 1, 0], sizes = [2, 1, 256], strides = [1, 1, 1]} : vector<2x8x256xf32> to vector<2x1x256xf32>
    %495 = vector.shape_cast %494 : vector<2x1x256xf32> to vector<2x256xf32>
    %496 = vector.shape_cast %29 : vector<1x256xi1> to vector<1x256xi1>
    %497 = vector.broadcast %496 : vector<1x256xi1> to vector<2x256xi1>
    %498 = arith.select %497, %493, %495 : vector<2x256xi1>, vector<2x256xf32>
    %cst_83 = arith.constant dense<0.000000e+00> : vector<2x256xf32>
    %499 = tpu.matmul %468, %33, %cst_83 {dimension_numbers = #tpu.dot_dimension_numbers<[1], [0], [0], [1], [0, 0, 1, 1], [], []>} : vector<2x64xf32>, vector<64x256xf32>, vector<2x256xf32> -> vector<2x256xf32>
    %500 = arith.addf %498, %499 : vector<2x256xf32>
    %501 = vector.extract_strided_slice %500 {offsets = [0, 0], sizes = [2, 64], strides = [1, 1]} : vector<2x256xf32> to vector<2x64xf32>
    %502 = arith.negf %501 : vector<2x64xf32>
    %503 = math.exp %502 : vector<2x64xf32>
    %cst_84 = arith.constant 1.000000e+00 : f32
    %504 = vector.broadcast %cst_84 : f32 to vector<2x64xf32>
    %505 = arith.addf %504, %503 : vector<2x64xf32>
    %506 = arith.divf %504, %505 : vector<2x64xf32>
    %507 = vector.extract_strided_slice %500 {offsets = [0, 64], sizes = [2, 64], strides = [1, 1]} : vector<2x256xf32> to vector<2x64xf32>
    %508 = arith.negf %507 : vector<2x64xf32>
    %509 = math.exp %508 : vector<2x64xf32>
    %cst_85 = arith.constant 1.000000e+00 : f32
    %510 = vector.broadcast %cst_85 : f32 to vector<2x64xf32>
    %511 = arith.addf %510, %509 : vector<2x64xf32>
    %512 = arith.divf %510, %511 : vector<2x64xf32>
    %513 = vector.extract_strided_slice %500 {offsets = [0, 128], sizes = [2, 64], strides = [1, 1]} : vector<2x256xf32> to vector<2x64xf32>
    %514 = math.tanh %513 : vector<2x64xf32>
    %515 = vector.extract_strided_slice %500 {offsets = [0, 192], sizes = [2, 64], strides = [1, 1]} : vector<2x256xf32> to vector<2x64xf32>
    %516 = arith.negf %515 : vector<2x64xf32>
    %517 = math.exp %516 : vector<2x64xf32>
    %cst_86 = arith.constant 1.000000e+00 : f32
    %518 = vector.broadcast %cst_86 : f32 to vector<2x64xf32>
    %519 = arith.addf %518, %517 : vector<2x64xf32>
    %520 = arith.divf %518, %519 : vector<2x64xf32>
    %521 = arith.mulf %512, %463 : vector<2x64xf32>
    %522 = arith.mulf %506, %514 : vector<2x64xf32>
    %523 = arith.addf %521, %522 : vector<2x64xf32>
    %524 = math.tanh %523 : vector<2x64xf32>
    %525 = arith.mulf %520, %524 : vector<2x64xf32>
    %526 = vector.extract_strided_slice %1 {offsets = [0, 6], sizes = [2, 1], strides = [1, 1]} : vector<2x8xf32> to vector<2x1xf32>
    %527 = vector.extract_strided_slice %1 {offsets = [0, 1], sizes = [2, 1], strides = [1, 1]} : vector<2x8xf32> to vector<2x1xf32>
    %528 = vector.shape_cast %32 : vector<1x64xi1> to vector<1x64xi1>
    %529 = vector.broadcast %528 : vector<1x64xi1> to vector<2x64xi1>
    %530 = vector.shape_cast %526 : vector<2x1xf32> to vector<2x1xf32>
    %531 = vector.broadcast %530 : vector<2x1xf32> to vector<2x64xf32>
    %532 = vector.shape_cast %527 : vector<2x1xf32> to vector<2x1xf32>
    %533 = vector.broadcast %532 : vector<2x1xf32> to vector<2x64xf32>
    %534 = arith.select %529, %531, %533 : vector<2x64xi1>, vector<2x64xf32>
    %535 = arith.mulf %534, %523 : vector<2x64xf32>
    %cst_87 = arith.constant 1.000000e+00 : f32
    %536 = vector.broadcast %cst_87 : f32 to vector<2x64xf32>
    %537 = arith.subf %536, %534 : vector<2x64xf32>
    %538 = arith.mulf %537, %463 : vector<2x64xf32>
    %539 = arith.addf %535, %538 : vector<2x64xf32>
    %540 = arith.mulf %534, %525 : vector<2x64xf32>
    %cst_88 = arith.constant 1.000000e+00 : f32
    %541 = vector.broadcast %cst_88 : f32 to vector<2x64xf32>
    %542 = arith.subf %541, %534 : vector<2x64xf32>
    %543 = arith.mulf %542, %468 : vector<2x64xf32>
    %544 = arith.addf %540, %543 : vector<2x64xf32>
    %545 = vector.extract_strided_slice %544 {offsets = [0, 0], sizes = [2, 16], strides = [1, 1]} : vector<2x64xf32> to vector<2x16xf32>
    %546 = vector.broadcast %2 : f32 to vector<2x16xf32>
    %547 = arith.mulf %545, %546 : vector<2x16xf32>
    %548 = vector.extract_strided_slice %544 {offsets = [0, 16], sizes = [2, 16], strides = [1, 1]} : vector<2x64xf32> to vector<2x16xf32>
    %549 = vector.broadcast %3 : f32 to vector<2x16xf32>
    %550 = arith.mulf %548, %549 : vector<2x16xf32>
    %551 = arith.addf %547, %550 : vector<2x16xf32>
    %552 = vector.extract_strided_slice %1 {offsets = [0, 6], sizes = [2, 1], strides = [1, 1]} : vector<2x8xf32> to vector<2x1xf32>
    %553 = vector.broadcast %552 : vector<2x1xf32> to vector<2x16xf32>
    %554 = arith.mulf %551, %553 : vector<2x16xf32>
    %555 = vector.extract_strided_slice %544 {offsets = [0, 32], sizes = [2, 16], strides = [1, 1]} : vector<2x64xf32> to vector<2x16xf32>
    %556 = vector.broadcast %2 : f32 to vector<2x16xf32>
    %557 = arith.mulf %555, %556 : vector<2x16xf32>
    %558 = vector.extract_strided_slice %544 {offsets = [0, 48], sizes = [2, 16], strides = [1, 1]} : vector<2x64xf32> to vector<2x16xf32>
    %559 = vector.broadcast %3 : f32 to vector<2x16xf32>
    %560 = arith.mulf %558, %559 : vector<2x16xf32>
    %561 = arith.addf %557, %560 : vector<2x16xf32>
    %c0_89 = arith.constant 0 : index
    %c6_90 = arith.constant 6 : index
    %c0_91 = arith.constant 0 : index
    %562 = vector.load %arg12[%c0_89, %c6_90, %c0_91] : memref<2x8x32xf32, #tpu.memory_space<vmem>>, vector<2x1x16xf32>
    %563 = vector.shape_cast %562 : vector<2x1x16xf32> to vector<2x16xf32>
    %564 = vector.shape_cast %554 : vector<2x16xf32> to vector<2x1x16xf32>
    tpu.vector_store %arg12[%c0_89, %c6_90, %c0_91], %564 {strides = array<i32>} : memref<2x8x32xf32, #tpu.memory_space<vmem>>, vector<2x1x16xf32>,
    %c0_92 = arith.constant 0 : index
    %c1_93 = arith.constant 1 : index
    %c16_94 = arith.constant 16 : index
    %565 = vector.load %arg12[%c0_92, %c1_93, %c16_94] : memref<2x8x32xf32, #tpu.memory_space<vmem>>, vector<2x1x16xf32>
    %566 = vector.shape_cast %565 : vector<2x1x16xf32> to vector<2x16xf32>
    %567 = vector.shape_cast %561 : vector<2x16xf32> to vector<2x1x16xf32>
    tpu.vector_store %arg12[%c0_92, %c1_93, %c16_94], %567 {strides = array<i32>} : memref<2x8x32xf32, #tpu.memory_space<vmem>>, vector<2x1x16xf32>,
    %568 = vector.extract_strided_slice %10 {offsets = [0, 7, 0], sizes = [2, 1, 256], strides = [1, 1, 1]} : vector<2x8x256xf32> to vector<2x1x256xf32>
    %569 = vector.shape_cast %568 : vector<2x1x256xf32> to vector<2x256xf32>
    %570 = vector.extract_strided_slice %10 {offsets = [0, 0, 0], sizes = [2, 1, 256], strides = [1, 1, 1]} : vector<2x8x256xf32> to vector<2x1x256xf32>
    %571 = vector.shape_cast %570 : vector<2x1x256xf32> to vector<2x256xf32>
    %572 = vector.shape_cast %29 : vector<1x256xi1> to vector<1x256xi1>
    %573 = vector.broadcast %572 : vector<1x256xi1> to vector<2x256xi1>
    %574 = arith.select %573, %569, %571 : vector<2x256xi1>, vector<2x256xf32>
    %cst_95 = arith.constant dense<0.000000e+00> : vector<2x256xf32>
    %575 = tpu.matmul %544, %33, %cst_95 {dimension_numbers = #tpu.dot_dimension_numbers<[1], [0], [0], [1], [0, 0, 1, 1], [], []>} : vector<2x64xf32>, vector<64x256xf32>, vector<2x256xf32> -> vector<2x256xf32>
    %576 = arith.addf %574, %575 : vector<2x256xf32>
    %577 = vector.extract_strided_slice %576 {offsets = [0, 0], sizes = [2, 64], strides = [1, 1]} : vector<2x256xf32> to vector<2x64xf32>
    %578 = arith.negf %577 : vector<2x64xf32>
    %579 = math.exp %578 : vector<2x64xf32>
    %cst_96 = arith.constant 1.000000e+00 : f32
    %580 = vector.broadcast %cst_96 : f32 to vector<2x64xf32>
    %581 = arith.addf %580, %579 : vector<2x64xf32>
    %582 = arith.divf %580, %581 : vector<2x64xf32>
    %583 = vector.extract_strided_slice %576 {offsets = [0, 64], sizes = [2, 64], strides = [1, 1]} : vector<2x256xf32> to vector<2x64xf32>
    %584 = arith.negf %583 : vector<2x64xf32>
    %585 = math.exp %584 : vector<2x64xf32>
    %cst_97 = arith.constant 1.000000e+00 : f32
    %586 = vector.broadcast %cst_97 : f32 to vector<2x64xf32>
    %587 = arith.addf %586, %585 : vector<2x64xf32>
    %588 = arith.divf %586, %587 : vector<2x64xf32>
    %589 = vector.extract_strided_slice %576 {offsets = [0, 128], sizes = [2, 64], strides = [1, 1]} : vector<2x256xf32> to vector<2x64xf32>
    %590 = math.tanh %589 : vector<2x64xf32>
    %591 = vector.extract_strided_slice %576 {offsets = [0, 192], sizes = [2, 64], strides = [1, 1]} : vector<2x256xf32> to vector<2x64xf32>
    %592 = arith.negf %591 : vector<2x64xf32>
    %593 = math.exp %592 : vector<2x64xf32>
    %cst_98 = arith.constant 1.000000e+00 : f32
    %594 = vector.broadcast %cst_98 : f32 to vector<2x64xf32>
    %595 = arith.addf %594, %593 : vector<2x64xf32>
    %596 = arith.divf %594, %595 : vector<2x64xf32>
    %597 = arith.mulf %588, %539 : vector<2x64xf32>
    %598 = arith.mulf %582, %590 : vector<2x64xf32>
    %599 = arith.addf %597, %598 : vector<2x64xf32>
    %600 = math.tanh %599 : vector<2x64xf32>
    %601 = arith.mulf %596, %600 : vector<2x64xf32>
    %602 = vector.extract_strided_slice %1 {offsets = [0, 7], sizes = [2, 1], strides = [1, 1]} : vector<2x8xf32> to vector<2x1xf32>
    %603 = vector.extract_strided_slice %1 {offsets = [0, 0], sizes = [2, 1], strides = [1, 1]} : vector<2x8xf32> to vector<2x1xf32>
    %604 = vector.shape_cast %32 : vector<1x64xi1> to vector<1x64xi1>
    %605 = vector.broadcast %604 : vector<1x64xi1> to vector<2x64xi1>
    %606 = vector.shape_cast %602 : vector<2x1xf32> to vector<2x1xf32>
    %607 = vector.broadcast %606 : vector<2x1xf32> to vector<2x64xf32>
    %608 = vector.shape_cast %603 : vector<2x1xf32> to vector<2x1xf32>
    %609 = vector.broadcast %608 : vector<2x1xf32> to vector<2x64xf32>
    %610 = arith.select %605, %607, %609 : vector<2x64xi1>, vector<2x64xf32>
    %611 = arith.mulf %610, %601 : vector<2x64xf32>
    %cst_99 = arith.constant 1.000000e+00 : f32
    %612 = vector.broadcast %cst_99 : f32 to vector<2x64xf32>
    %613 = arith.subf %612, %610 : vector<2x64xf32>
    %614 = arith.mulf %613, %544 : vector<2x64xf32>
    %615 = arith.addf %611, %614 : vector<2x64xf32>
    %616 = vector.extract_strided_slice %615 {offsets = [0, 0], sizes = [2, 16], strides = [1, 1]} : vector<2x64xf32> to vector<2x16xf32>
    %617 = vector.broadcast %2 : f32 to vector<2x16xf32>
    %618 = arith.mulf %616, %617 : vector<2x16xf32>
    %619 = vector.extract_strided_slice %615 {offsets = [0, 16], sizes = [2, 16], strides = [1, 1]} : vector<2x64xf32> to vector<2x16xf32>
    %620 = vector.broadcast %3 : f32 to vector<2x16xf32>
    %621 = arith.mulf %619, %620 : vector<2x16xf32>
    %622 = arith.addf %618, %621 : vector<2x16xf32>
    %623 = vector.extract_strided_slice %1 {offsets = [0, 7], sizes = [2, 1], strides = [1, 1]} : vector<2x8xf32> to vector<2x1xf32>
    %624 = vector.broadcast %623 : vector<2x1xf32> to vector<2x16xf32>
    %625 = arith.mulf %622, %624 : vector<2x16xf32>
    %626 = vector.extract_strided_slice %615 {offsets = [0, 32], sizes = [2, 16], strides = [1, 1]} : vector<2x64xf32> to vector<2x16xf32>
    %627 = vector.broadcast %2 : f32 to vector<2x16xf32>
    %628 = arith.mulf %626, %627 : vector<2x16xf32>
    %629 = vector.extract_strided_slice %615 {offsets = [0, 48], sizes = [2, 16], strides = [1, 1]} : vector<2x64xf32> to vector<2x16xf32>
    %630 = vector.broadcast %3 : f32 to vector<2x16xf32>
    %631 = arith.mulf %629, %630 : vector<2x16xf32>
    %632 = arith.addf %628, %631 : vector<2x16xf32>
    %c0_100 = arith.constant 0 : index
    %c7_101 = arith.constant 7 : index
    %c0_102 = arith.constant 0 : index
    %633 = vector.load %arg12[%c0_100, %c7_101, %c0_102] : memref<2x8x32xf32, #tpu.memory_space<vmem>>, vector<2x1x16xf32>
    %634 = vector.shape_cast %633 : vector<2x1x16xf32> to vector<2x16xf32>
    %635 = vector.shape_cast %625 : vector<2x16xf32> to vector<2x1x16xf32>
    tpu.vector_store %arg12[%c0_100, %c7_101, %c0_102], %635 {strides = array<i32>} : memref<2x8x32xf32, #tpu.memory_space<vmem>>, vector<2x1x16xf32>,
    %c0_103 = arith.constant 0 : index
    %c0_104 = arith.constant 0 : index
    %c16_105 = arith.constant 16 : index
    %636 = vector.load %arg12[%c0_103, %c0_104, %c16_105] : memref<2x8x32xf32, #tpu.memory_space<vmem>>, vector<2x1x16xf32>
    %637 = vector.shape_cast %636 : vector<2x1x16xf32> to vector<2x16xf32>
    %638 = vector.shape_cast %632 : vector<2x16xf32> to vector<2x1x16xf32>
    tpu.vector_store %arg12[%c0_103, %c0_104, %c16_105], %638 {strides = array<i32>} : memref<2x8x32xf32, #tpu.memory_space<vmem>>, vector<2x1x16xf32>,
    %c0_106 = arith.constant 0 : index
    %c0_107 = arith.constant 0 : index
    %c0_108 = arith.constant 0 : index
    %639 = vector.load %arg12[%c0_106, %c0_107, %c0_108] : memref<2x8x32xf32, #tpu.memory_space<vmem>>, vector<2x8x32xf32>
    %cst_109 = arith.constant 5.000000e-01 : f32
    %640 = vector.broadcast %cst_109 : f32 to vector<2x8xf32>
    %641 = arith.cmpf ogt, %1, %640 : vector<2x8xf32>
    %c0_110 = arith.constant 0 : index
    %c0_111 = arith.constant 0 : index
    %642 = vector.load %arg5[%c0_110, %c0_111] : memref<1x32xf32, #tpu.memory_space<vmem>>, vector<1x32xf32>
    %643 = vector.shape_cast %642 : vector<1x32xf32> to vector<1x1x32xf32>
    %644 = vector.broadcast %643 : vector<1x1x32xf32> to vector<2x8x32xf32>
    %645 = arith.mulf %639, %644 : vector<2x8x32xf32>
    %cst_112 = arith.constant dense<0.000000e+00> : vector<2x8xf32>
    %646 = vector.multi_reduction <add>, %645, %cst_112 [2] : vector<2x8x32xf32> to vector<2x8xf32>
    %c0_113 = arith.constant 0 : index
    %c0_114 = arith.constant 0 : index
    %647 = memref.load %arg6[%c0_113, %c0_114] : memref<1x1xf32, #tpu.memory_space<smem>>
    %648 = vector.broadcast %647 : f32 to vector<2x8xf32>
    %649 = arith.addf %646, %648 : vector<2x8xf32>
    %cst_115 = arith.constant -1.000000e+30 : f32
    %650 = vector.broadcast %cst_115 : f32 to vector<2x8xf32>
    %651 = arith.select %641, %649, %650 : vector<2x8xi1>, vector<2x8xf32>
    %cst_116 = arith.constant dense<0xFF800000> : vector<2xf32>
    %652 = vector.multi_reduction <maximumf>, %651, %cst_116 [1] : vector<2x8xf32> to vector<2xf32>
    %653 = vector.shape_cast %652 : vector<2xf32> to vector<2x1xf32>
    %654 = vector.broadcast %653 : vector<2x1xf32> to vector<2x8xf32>
    %655 = arith.subf %651, %654 : vector<2x8xf32>
    %656 = math.exp %655 : vector<2x8xf32>
    %cst_117 = arith.constant dense<0.000000e+00> : vector<2xf32>
    %657 = vector.multi_reduction <add>, %656, %cst_117 [1] : vector<2x8xf32> to vector<2xf32>
    %658 = vector.shape_cast %657 : vector<2xf32> to vector<2x1xf32>
    %659 = tpu.reciprocal %658 {approx = true} : vector<2x1xf32> -> vector<2x1xf32>
    %660 = vector.broadcast %659 : vector<2x1xf32> to vector<2x8xf32>
    %661 = arith.mulf %656, %660 : vector<2x8xf32>
    %662 = vector.shape_cast %661 : vector<2x8xf32> to vector<2x8x1xf32>
    %663 = vector.broadcast %662 : vector<2x8x1xf32> to vector<2x8x32xf32>
    %664 = arith.mulf %663, %639 : vector<2x8x32xf32>
    %cst_118 = arith.constant dense<0.000000e+00> : vector<2x32xf32>
    %665 = vector.multi_reduction <add>, %664, %cst_118 [1] : vector<2x8x32xf32> to vector<2x32xf32>
    %666 = vector.shape_cast %639 : vector<2x8x32xf32> to vector<16x32xf32>
    %c0_119 = arith.constant 0 : index
    %c0_120 = arith.constant 0 : index
    %667 = vector.load %arg7[%c0_119, %c0_120] : memref<32x32xf32, #tpu.memory_space<vmem>>, vector<32x32xf32>
    %cst_121 = arith.constant dense<0.000000e+00> : vector<16x32xf32>
    %668 = tpu.matmul %666, %667, %cst_121 {dimension_numbers = #tpu.dot_dimension_numbers<[1], [0], [0], [1], [0, 0, 1, 1], [], []>} : vector<16x32xf32>, vector<32x32xf32>, vector<16x32xf32> -> vector<16x32xf32>
    %c0_122 = arith.constant 0 : index
    %c0_123 = arith.constant 0 : index
    %669 = vector.load %arg8[%c0_122, %c0_123] : memref<1x32xf32, #tpu.memory_space<vmem>>, vector<1x32xf32>
    %670 = vector.broadcast %669 : vector<1x32xf32> to vector<16x32xf32>
    %671 = arith.addf %668, %670 : vector<16x32xf32>
    %672 = vector.shape_cast %671 : vector<16x32xf32> to vector<2x8x32xf32>
    %c0_124 = arith.constant 0 : index
    %c0_125 = arith.constant 0 : index
    %673 = vector.load %arg9[%c0_124, %c0_125] : memref<32x32xf32, #tpu.memory_space<vmem>>, vector<32x32xf32>
    %cst_126 = arith.constant dense<0.000000e+00> : vector<16x32xf32>
    %674 = tpu.matmul %666, %673, %cst_126 {dimension_numbers = #tpu.dot_dimension_numbers<[1], [0], [0], [1], [0, 0, 1, 1], [], []>} : vector<16x32xf32>, vector<32x32xf32>, vector<16x32xf32> -> vector<16x32xf32>
    %c0_127 = arith.constant 0 : index
    %c0_128 = arith.constant 0 : index
    %675 = vector.load %arg10[%c0_127, %c0_128] : memref<1x32xf32, #tpu.memory_space<vmem>>, vector<1x32xf32>
    %676 = vector.broadcast %675 : vector<1x32xf32> to vector<16x32xf32>
    %677 = arith.addf %674, %676 : vector<16x32xf32>
    %678 = vector.shape_cast %677 : vector<16x32xf32> to vector<2x8x32xf32>
    %cst_129 = arith.constant dense<0.000000e+00> : vector<2x32xf32>
    %679 = vector.multi_reduction <add>, %678, %cst_129 [1] : vector<2x8x32xf32> to vector<2x32xf32>
    %680 = vector.shape_cast %679 : vector<2x32xf32> to vector<2x1x32xf32>
    %681 = vector.broadcast %680 : vector<2x1x32xf32> to vector<2x8x32xf32>
    %682 = arith.mulf %672, %681 : vector<2x8x32xf32>
    %cst_130 = arith.constant dense<0.000000e+00> : vector<2x8xf32>
    %683 = vector.multi_reduction <add>, %682, %cst_130 [2] : vector<2x8x32xf32> to vector<2x8xf32>
    %cst_131 = arith.constant 0.176776692 : f32
    %684 = vector.broadcast %cst_131 : f32 to vector<2x8xf32>
    %685 = arith.mulf %683, %684 : vector<2x8xf32>
    %cst_132 = arith.constant -1.000000e+30 : f32
    %686 = vector.broadcast %cst_132 : f32 to vector<2x8xf32>
    %687 = arith.select %641, %685, %686 : vector<2x8xi1>, vector<2x8xf32>
    %cst_133 = arith.constant dense<0xFF800000> : vector<2xf32>
    %688 = vector.multi_reduction <maximumf>, %687, %cst_133 [1] : vector<2x8xf32> to vector<2xf32>
    %689 = vector.shape_cast %688 : vector<2xf32> to vector<2x1xf32>
    %690 = vector.broadcast %689 : vector<2x1xf32> to vector<2x8xf32>
    %691 = arith.subf %687, %690 : vector<2x8xf32>
    %692 = math.exp %691 : vector<2x8xf32>
    %cst_134 = arith.constant dense<0.000000e+00> : vector<2xf32>
    %693 = vector.multi_reduction <add>, %692, %cst_134 [1] : vector<2x8xf32> to vector<2xf32>
    %694 = vector.shape_cast %693 : vector<2xf32> to vector<2x1xf32>
    %695 = tpu.reciprocal %694 {approx = true} : vector<2x1xf32> -> vector<2x1xf32>
    %696 = vector.broadcast %695 : vector<2x1xf32> to vector<2x8xf32>
    %697 = arith.mulf %692, %696 : vector<2x8xf32>
    %698 = vector.shape_cast %697 : vector<2x8xf32> to vector<2x8x1xf32>
    %699 = vector.broadcast %698 : vector<2x8x1xf32> to vector<2x8x32xf32>
    %700 = arith.mulf %699, %639 : vector<2x8x32xf32>
    %cst_135 = arith.constant dense<0.000000e+00> : vector<2x32xf32>
    %701 = vector.multi_reduction <add>, %700, %cst_135 [1] : vector<2x8x32xf32> to vector<2x32xf32>
    %702 = vector.broadcast %2 : f32 to vector<2x32xf32>
    %703 = arith.mulf %665, %702 : vector<2x32xf32>
    %704 = vector.broadcast %3 : f32 to vector<2x32xf32>
    %705 = arith.mulf %701, %704 : vector<2x32xf32>
    %706 = arith.addf %703, %705 : vector<2x32xf32>
    %c0_136 = arith.constant 0 : index
    %c0_137 = arith.constant 0 : index
    %707 = vector.load %arg13[%c0_136, %c0_137] : memref<2x32xf32, #tpu.memory_space<vmem>>, vector<2x32xf32>
    tpu.vector_store %arg13[%c0_136, %c0_137], %706 {strides = array<i32>} : memref<2x32xf32, #tpu.memory_space<vmem>>, vector<2x32xf32>,
    return
  }
}

</mosaic_0001>

<bundles_post_ra>
// kernel: tpu_custom_call.1
= control target key start
LH: loop header
LB: loop body
LE: loop exit
PB: predicated region body
PF: predicated region fallthrough
CT: control target
= control target key end

     0   :  { %21 = vsyncpa [#allocation5], 0  ;;  %s3697_s0 = inlined_call_operand.hbm [shape: f32[2,8,32], index: 0, kind: input, shape index: {}]   ;;  %s3698_s1 = inlined_call_operand.vmem [shape: f32[2,8], index: 1, kind: input, shape index: {}]   ;;  %s3699_s2 = inlined_call_operand.hbm [shape: f32[32,256], index: 2, kind: input, shape index: {}]   ;;  %s3700_s3 = inlined_call_operand.hbm [shape: f32[64,256], index: 3, kind: input, shape index: {}]   ;;  %s3701_s4 = inlined_call_operand.vmem [shape: f32[1,256], index: 4, kind: input, shape index: {}]   ;;  %s3702_s5 = inlined_call_operand.vmem [shape: f32[1,32], index: 5, kind: input, shape index: {}]   ;;  %s3703_s6 = inlined_call_operand.<no memory space> [shape: f32[1,1], index: 6, kind: input, shape index: {}]   ;;  %s3704_s7 = inlined_call_operand.hbm [shape: f32[32,32], index: 7, kind: input, shape index: {}]   ;;  %s3705_s8 = inlined_call_operand.hbm [shape: f32[1,32], index: 8, kind: input, shape index: {}]   ;;  %s3706_s9 = inlined_call_operand.vmem [shape: f32[32,32], index: 9, kind: input, shape index: {}]   ;;  %s3707_s10 = inlined_call_operand.vmem [shape: f32[1,32], index: 10, kind: input, shape index: {}]   ;;  %s3708_s11 = inlined_call_operand.<no memory space> [shape: f32[1,1], index: 11, kind: input, shape index: {}]   ;;  %s3709_s12 = inlined_call_operand.hbm [shape: f32[2,8,32], index: 12, kind: output, shape index: {0}]   ;;  %s3710_s13 = inlined_call_operand.hbm [shape: f32[2,32], index: 13, kind: output, shape index: {1}]  }
   0x1   :  { %22 = vsyncpa [#allocation8], 0 }
   0x2   :  { %23 = vsyncpa [#allocation11], 0 }
   0x3   :  { %24 = vsyncpa [#allocation6], 0 }
   0x4   :  { %25 = vsyncpa [#allocation15], 0  ;;  %s2814_s25 = smov [#allocation7]   ;;  %s2650_s29 = scalar_lea.hbm %s3699_s2, 1024 }
   0x5   :  { %s45_s26 = sshll.u32 %s2814_s25, 4  ;;  %p2651_p0 = scmp.ne.s32.totalorder %s3699_s2, %s2650_s29  ;;  %s46_s26 = int_to_ptr.vmem [resolvable:$true] %s45_s26 }
   0x6   :  { %p2654_p1 = scmp.lt.u32.totalorder %s2650_s29, %s3699_s2 }
   0x8   :  { %p2656_p2 = pnand %p2654_p1, %p2651_p0 }
   0xa   :  { %2659 = shalt.err (!%p2656_p2)
}
   0xb   :  { %s2660_s17 = scalar_lea.vmem %s46_s26, 1024  ;;  %p2665_p4 = scmp.lt.s32.totalorder %s46_s26, %s46_s26 }
   0xc   :  { %p2661_p3 = scmp.ne.s32.totalorder %s46_s26, %s2660_s17  ;;  %p2666_p5 = scmp.lt.s32.totalorder %s2660_s17, %s2660_s17 }
   0xe   :  { %p2667_p6 = por %p2666_p5, %p2665_p4 }
  0x10   :  { %p2668_p7 = pnand %p2667_p6, %p2661_p3 }
  0x12   :  { %2671 = shalt.err (!%p2668_p7)
}
  0x13   :  { %s2815_s18 = smov 256   ;;  %s2816_s19 = smov 16  }
  0x14   :  { %51 = dma.hbm_to_vmem [thread:$0]  %s3699_s2, 1024, %s46_s26, [#allocation8], %s2815_s18, %s2815_s18, %s2816_s19  }
  0x15   :  { %s2817_s22 = smov [#allocation10]   ;;  %s2818_s24 = smov [#allocation4]  }
  0x16   :  { %s75_s23 = sshll.u32 %s2817_s22, 4  ;;  %s31_s25 = sshll.u32 %s2818_s24, 4  ;;  %s76_s23 = int_to_ptr.vmem [resolvable:$true] %s75_s23  ;;  %s32_s25 = int_to_ptr.vmem [resolvable:$true] %s31_s25 }
  0x17   :  { %s2672_s29 = scalar_lea.hbm %s3704_s7, 512 }
  0x18   :  { %p2673_p8 = scmp.ne.s32.totalorder %s3704_s7, %s2672_s29  ;;  %p2676_p9 = scmp.lt.u32.totalorder %s2672_s29, %s3704_s7 }
  0x1a   :  { %p2678_p10 = pnand %p2676_p9, %p2673_p8 }
  0x1c   :  { %2681 = shalt.err (!%p2678_p10)
}
  0x1d   :  { %s2682_s2 = scalar_lea.vmem %s76_s23, 512  ;;  %p2687_p12 = scmp.lt.s32.totalorder %s76_s23, %s76_s23 }
  0x1e   :  { %p2683_p11 = scmp.ne.s32.totalorder %s76_s23, %s2682_s2  ;;  %p2688_p13 = scmp.lt.s32.totalorder %s2682_s2, %s2682_s2 }
  0x20   :  { %p2689_p0 = por %p2688_p13, %p2687_p12 }
  0x22   :  { %p2690_p1 = pnand %p2689_p0, %p2683_p11 }
  0x24   :  { %2693 = shalt.err (!%p2690_p1)
}
  0x25   :  { %s2819_s26 = smov 128   ;;  %s2820_s17 = smov 8  }
  0x26   :  { %81 = dma.hbm_to_vmem [thread:$0]  %s3704_s7, 512, %s76_s23, [#allocation11], %s2819_s26, %s2819_s26, %s2820_s17  }
  0x27   :  { %s2694_s27 = scalar_lea.hbm %s3697_s0, 256 }
  0x28   :  { %p2695_p2 = scmp.ne.s32.totalorder %s3697_s0, %s2694_s27  ;;  %p2698_p3 = scmp.lt.u32.totalorder %s2694_s27, %s3697_s0 }
  0x2a   :  { %p2700_p4 = pnand %p2698_p3, %p2695_p2 }
  0x2c   :  { %2703 = shalt.err (!%p2700_p4)
}
  0x2d   :  { %s2704_s15 = scalar_lea.vmem %s32_s25, 256  ;;  %p2709_p6 = scmp.lt.s32.totalorder %s32_s25, %s32_s25 }
  0x2e   :  { %p2705_p5 = scmp.ne.s32.totalorder %s32_s25, %s2704_s15  ;;  %p2710_p7 = scmp.lt.s32.totalorder %s2704_s15, %s2704_s15 }
  0x30   :  { %p2711_p8 = por %p2710_p7, %p2709_p6 }
  0x32   :  { %p2712_p9 = pnand %p2711_p8, %p2705_p5 }
  0x34   :  { %2715 = shalt.err (!%p2712_p9)
}
  0x35   :  { %37 = dma.hbm_to_vmem [thread:$0]  %s3697_s0, 256, %s32_s25, [#allocation5], %s2819_s26, %s2819_s26, %s2820_s17  }
  0x36   :  { %s2821_s16 = smov [#allocation9]   ;;  %s2822_s20 = smov [#allocation12]  }
  0x37   :  { %s57_s2 = sshll.u32 %s2821_s16, 4  ;;  %s88_s21 = sshll.u32 %s2822_s20, 4  ;;  %s58_s2 = int_to_ptr.vmem [resolvable:$true] %s57_s2  ;;  %s89_s21 = int_to_ptr.vmem [resolvable:$true] %s88_s21 }
  0x38   :  { %s2716_s27 = scalar_lea.hbm %s3700_s3, 2048 }
  0x39   :  { %p2717_p10 = scmp.ne.s32.totalorder %s3700_s3, %s2716_s27  ;;  %p2720_p11 = scmp.lt.u32.totalorder %s2716_s27, %s3700_s3 }
  0x3b   :  { %p2722_p12 = pnand %p2720_p11, %p2717_p10 }
  0x3d   :  { %2725 = shalt.err (!%p2722_p12)
}
  0x3e   :  { %s2726_s0 = scalar_lea.vmem %s58_s2, 2048  ;;  %p2731_p0 = scmp.lt.s32.totalorder %s58_s2, %s58_s2 }
  0x3f   :  { %p2727_p13 = scmp.ne.s32.totalorder %s58_s2, %s2726_s0  ;;  %p2732_p1 = scmp.lt.s32.totalorder %s2726_s0, %s2726_s0 }
  0x41   :  { %p2733_p2 = por %p2732_p1, %p2731_p0 }
  0x43   :  { %p2734_p3 = pnand %p2733_p2, %p2727_p13 }
  0x45   :  { %2737 = shalt.err (!%p2734_p3)
}
  0x46   :  { %63 = dma.hbm_to_vmem [thread:$0]  %s3700_s3, 2048, %s58_s2, [#allocation8], %s2815_s18, %s2815_s18, %s2816_s19  }
  0x47   :  { %s2738_s16 = scalar_lea.hbm %s3705_s8, 16 }
  0x48   :  { %p2739_p4 = scmp.ne.s32.totalorder %s3705_s8, %s2738_s16  ;;  %p2742_p5 = scmp.lt.u32.totalorder %s2738_s16, %s3705_s8 }
  0x4a   :  { %p2744_p6 = pnand %p2742_p5, %p2739_p4 }
  0x4c   :  { %2747 = shalt.err (!%p2744_p6)
}
  0x4d   :  { %s2748_s28 = scalar_lea.vmem %s89_s21, 16  ;;  %s2752_s29 = scalar_lea.vmem %s89_s21, 32 }
  0x4e   :  { %p2749_p7 = scmp.ne.s32.totalorder %s89_s21, %s2748_s28  ;;  %p2753_p8 = scmp.lt.s32.totalorder %s89_s21, %s89_s21 }
  0x4f   :  { %p2754_p9 = scmp.lt.s32.totalorder %s2752_s29, %s2748_s28 }
  0x51   :  { %p2755_p10 = por %p2754_p9, %p2753_p8 }
  0x53   :  { %p2756_p11 = pnand %p2755_p10, %p2749_p7 }
  0x55   :  { %2759 = shalt.err (!%p2756_p11)
}
  0x56   :  { %91 = dma.hbm_to_vmem [thread:$0]  %s3705_s8, 16, %s89_s21, [#allocation11]  }
  0x57   :  { %2804 = dma.done.wait [#allocation5], 256  }
  0x58   :  { %2805 = vsyncadd [#allocation5], 4294967040 }
  0x59   :  { %2806 = dma.done.wait [#allocation8], 3072  }
  0x5a   :  { %2807 = vsyncadd [#allocation8], 4294964224 }
  0x5b   :  { %2808 = dma.done.wait [#allocation11], 528  }
  0x5c   :  { %2809 = vsyncadd [#allocation11], 4294966768  ;;  %v2823_v0 = vmov 0.0   ;;  %v119_v1 = vld [vmem:[#allocation7 + $0x8] sm:$0xff]  ;;  %v121_v2 = vld [vmem:[#allocation7 + $0x18] sm:$0xff]  ;;  %vm138_vm0 = vcmask 261120   ;;  %v128_v42 = vlaneseq }
  0x5d   :  { %209 = vmatprep.mubr.f32.mxu0 %v2823_v0  ;;  %361 = vmatprep.mubr.f32.mxu1 %v2823_v0  ;;  %v118_v3 = vld [vmem:[#allocation7] sm:$0xff]  ;;  %v2361_v4 = vpack.c.bf16 %v121_v2, %v119_v1  ;;  %v120_v5 = vld [vmem:[#allocation7 + $0x10] sm:$0xff]  ;;  %v253_v6 = vld [vmem:[#allocation9 + $0x8] sm:$0xff]  ;;  %v2824_v40 = vmov 7   ;;  %v2825_v41 = vmov 0   ;;  %vm277_vm2 = vcmask 1041409  }
  0x5e   :  { %v255_v7 = vld [vmem:[#allocation9 + $0x18] sm:$0xff]  ;;  %v2363_v8 = vpack.c.bf16 %v120_v5, %v118_v3  ;;  %v252_v10 = vld [vmem:[#allocation9] sm:$0xff]  ;;  %v254_v11 = vld [vmem:[#allocation9 + $0x10] sm:$0xff]  ;;  %2537 = vset.pattern.permute.xlu1 %v2824_v40  ;;  %2536 = vset.pattern.permute.xlu0 %v2825_v41  ;;  %v3035_v43 = vshrl.u32 %v128_v42, 7  ;;  %v3037_v44 = vand.u32 127, %v128_v42  ;;  %vm293_vm5 = vcmask 523264  }
  0x5f   :  { %v2981_v9 = vpack.c.bf16 %v255_v7, %v253_v6  ;;  %v123_v12 = vld [vmem:[#allocation7 + $0x28] sm:$0xff]  ;;  %2362 = vmatprep.subr.bf16.mxu0 %v2361_v4  ;;  %v2983_v13 = vpack.c.bf16 %v254_v11, %v252_v10  ;;  %v125_v14 = vld [vmem:[#allocation7 + $0x38] sm:$0xff]  ;;  %v122_v15 = vld [vmem:[#allocation7 + $0x20] sm:$0xff]  ;;  %s117_s0 = ssub.f32 1.0, %s3708_s11  ;;  %s2833_s25 = smov 112   ;;  %vm453_vm6 = vcmask 122880  }
  0x60   :  { %v124_v16 = vld [vmem:[#allocation7 + $0x30] sm:$0xff]  ;;  %2364 = vmatpush1.bf16.msra.mxu0 %v2363_v8  ;;  %v2365_v17 = vpack.c.bf16 %v125_v14, %v123_v12  ;;  %v257_v19 = vld [vmem:[#allocation9 + $0x28] sm:$0xff]  ;;  %v259_v20 = vld [vmem:[#allocation9 + $0x38] sm:$0xff]  ;;  %v3040_v45 = vsub.s32 0, %v3035_v43  ;;  %v3046_v47 = vsub.s32 1, %v3035_v43  ;;  %v224_v48 = vadd.s32 128, %v3037_v44 }
  0x61   :  { %2370 = vmatprep.subr.bf16.mxu1 %v2981_v9  ;;  %v2367_v18 = vpack.c.bf16 %v124_v16, %v122_v15  ;;  %v256_v21 = vld [vmem:[#allocation9 + $0x20] sm:$0xff]  ;;  %v2987_v22 = vpack.c.bf16 %v259_v20, %v257_v19  ;;  %v258_v23 = vld [vmem:[#allocation9 + $0x30] sm:$0xff]  ;;  %v261_v24 = vld [vmem:[#allocation9 + $0x48] sm:$0xff]  ;;  %v229_v51 = vand.u32 63, %v3037_v44  ;;  %vm251_vm4 = vcmp.lt.s32.totalorder %v3037_v44, 32 }
  0x62   :  { %2372 = vmatpush1.bf16.msra.mxu1 %v2983_v13  ;;  %2366 = vmatprep.subr.bf16.mxu0 %v2365_v17  ;;  %v2989_v25 = vpack.c.bf16 %v258_v23, %v256_v21  ;;  %v263_v26 = vld [vmem:[#allocation9 + $0x58] sm:$0xff]  ;;  %v260_v27 = vld [vmem:[#allocation9 + $0x40] sm:$0xff]  ;;  %v262_v28 = vld [vmem:[#allocation9 + $0x50] sm:$0xff]  ;;  %v236_v52 = vand.u32 63, %v224_v48  ;;  %vm493_vm7 = vcmask 254080   ;;  %vm1952_vm9 = vcmask 58368  }
  0x63   :  { %2374 = vmatprep.subr.bf16.mxu1 %v2987_v22  ;;  %v2992_v29 = vpack.c.bf16 %v263_v26, %v261_v24  ;;  %v265_v30 = vld [vmem:[#allocation9 + $0x68] sm:$0xff]  ;;  %v267_v31 = vld [vmem:[#allocation9 + $0x78] sm:$0xff]  ;;  %v113_v32 = vld [vmem:[#allocation4] sm:$0xff]  ;;  %v2995_v33 = vpack.c.bf16 %v262_v28, %v260_v27  ;;  %vm3054_vm1 = vcmp.lt.s32.totalorder %v229_v51, 32 }
  0x64   :  { %2368 = vmatpush1.bf16.msra.mxu0 %v2367_v18  ;;  %v2999_v34 = vpack.c.bf16 %v267_v31, %v265_v30  ;;  %v264_v35 = vld [vmem:[#allocation9 + $0x60] sm:$0xff]  ;;  %v266_v36 = vld [vmem:[#allocation9 + $0x70] sm:$0xff]  ;;  %v114_v37 = vld [vmem:[#allocation4 + $0x8] sm:$0xff]  ;;  %vm3058_vm3 = vcmp.lt.s32.totalorder %v236_v52, 32 }
  0x65   :  { %2386 = vmatprep.subr.bf16.mxu0 %v2981_v9  ;;  %v3005_v38 = vpack.c.bf16 %v266_v36, %v264_v35  ;;  %v3032_v39 = vld [vmem:[%s3698_s1] sm:$0x3] }
  0x66   :  { %2376 = vmatpush1.bf16.msra.mxu1 %v2989_v25  ;;  %400 = vperm.xlu1 %2537, %v3032_v39   ;;  %v126_v46 = vld [vmem:[%s3701_s4] sm:$0x3]  ;;  %s2826_s4 = smov 64  }
  0x67   :  { %2378 = vmatprep.subr.bf16.mxu1 %v2992_v29  ;;  %2295 = vmatmul.mubr.msk.f32.vlgmr.msra.gmra.mrb[0].mxu0 %vm138_vm0, %v113_v32  ;;  %v131_v49 = vrot.slane %v126_v46, %v3040_v45  ;;  %v135_v50 = vrot.slane %v126_v46, %v3046_v47 }
  0x68   :  { %215 = vmatprep.mubr.f32.mxu0 %v2823_v0  ;;  %2388 = vmatpush1.bf16.msra.mxu0 %v2983_v13 }
  0x69   :  { %2390 = vmatprep.subr.bf16.mxu0 %v2987_v22 }
  0x6a   :  { %2380 = vmatpush1.bf16.msra.mxu1 %v2995_v33 }
  0x6b   :  { %2382 = vmatprep.subr.bf16.mxu1 %v2999_v34  ;;  %2296 = vmatmul.mubr.msk.f32.gmra.mrb[2].mxu0 %vm138_vm0, %v114_v37 }
  0x6c   :  { %2392 = vmatpush1.bf16.msra.mxu0 %v2989_v25  ;;  %579 = vmatprep.mubr.f32.mxu0 %v2823_v0 }
  0x6d   :  { %2394 = vmatprep.subr.bf16.mxu0 %v2992_v29 }
  0x6e   :  { %2384 = vmatpush1.bf16.msra.mxu1 %v3005_v38 }
  0x6f   :  { %2402 = vmatprep.subr.bf16.mxu1 %v2981_v9 }
  0x70   :  { %2396 = vmatpush1.bf16.msra.mxu0 %v2995_v33 }
  0x71   :  { %362 = vmatmul.mubr.f32.vlgmr.msra.gmra.mrb[0].mxu1 %v2823_v0  ;;  %2398 = vmatprep.subr.bf16.mxu0 %v2999_v34 }
  0x72   :  { %2404 = vmatpush1.bf16.msra.mxu1 %v2983_v13  ;;  %797 = vmatprep.mubr.f32.mxu1 %v2823_v0 }
  0x73   :  { %2406 = vmatprep.subr.bf16.mxu1 %v2987_v22 }
  0x74   :  { %2400 = vmatpush1.bf16.msra.mxu0 %v3005_v38 }
  0x75   :  { %2418 = vmatprep.subr.bf16.mxu0 %v2981_v9 }
  0x76   :  { %2408 = vmatpush1.bf16.msra.mxu1 %v2989_v25 }
  0x77   :  { %2410 = vmatprep.subr.bf16.mxu1 %v2992_v29 }
  0x7a   :  { %2412 = vmatpush1.bf16.msra.mxu1 %v2995_v33 }
  0x7b   :  { %2414 = vmatprep.subr.bf16.mxu1 %v2999_v34 }
  0x7e   :  { %2416 = vmatpush1.bf16.msra.mxu1 %v3005_v38 }
  0x7f   :  { %2434 = vmatprep.subr.bf16.mxu1 %v2981_v9 }
 0x13a   :  { %v211_v53 = vpop.f32.mrb[0].mxu0 }
 0x13b   :  { %v212_v54 = vadd.f32 %v211_v53, %v131_v49  ;;  %v213_v55 = vpop.f32.mrb[1].mxu0 }
 0x13c   :  { %v3052_v56 = vadd.f32 %v213_v55, %v135_v50 }
 0x13d   :  { %v283_v58 = vrot.slane %v212_v54, 7  ;;  %v496_v62 = vrot.slane %v212_v54, 1  ;;  %v502_v63 = vrot.slane %v212_v54, 6  ;;  %v712_v1 = vrot.slane %v212_v54, 2 }
 0x13e   :  { %v217_v60 = vpop.f32.mrb[2].mxu0  ;;  %v286_v61 = vrot.slane %v3052_v56, 7  ;;  %v498_v4 = vrot.slane %v3052_v56, 1  ;;  %v505_v5 = vrot.slane %v3052_v56, 6  ;;  %v720_v6 = vrot.slane %v212_v54, 5 }
 0x13f   :  { %v218_v2 = vadd.f32 %v217_v60, %v131_v49  ;;  %v219_v3 = vpop.f32.mrb[3].mxu0  ;;  %v715_v8 = vrot.slane %v3052_v56, 2  ;;  %v723_v10 = vrot.slane %v3052_v56, 5  ;;  %v930_v11 = vrot.slane %v212_v54, 3 }
 0x140   :  { %v220_v7 = vadd.f32 %v219_v3, %v135_v50  ;;  %v938_v60 = vrot.slane %v212_v54, 4 }
 0x141   :  { %v276_v12 = vrot.slane %v218_v2, 7  ;;  %v284_v14 = vrot.slane %v218_v2, 6  ;;  %v3068_v15 = vsel %vm277_vm2, %v218_v2, %v496_v62  ;;  %v503_v16 = vrot.slane %v218_v2, 5 }
 0x142   :  { %v279_v17 = vrot.slane %v220_v7, 7  ;;  %v287_v18 = vrot.slane %v220_v7, 6  ;;  %v3071_v19 = vsel %vm277_vm2, %v220_v7, %v498_v4  ;;  %v506_v20 = vrot.slane %v220_v7, 5 }
 0x143   :  { %v3074_v21 = vsel %vm277_vm2, %v276_v12, %v212_v54  ;;  %v3077_v23 = vsel %vm277_vm2, %v284_v14, %v283_v58  ;;  %v3080_v26 = vsel %vm277_vm2, %v503_v16, %v502_v63  ;;  %v713_v27 = vrot.slane %v218_v2, 1 }
 0x144   :  { %v363_v24 = vpop.f32.mrb[0].mxu1  ;;  %v291_v28 = vsel %vm3054_vm1, %v3074_v21, %v3077_v23  ;;  %v3088_v30 = vsel %vm277_vm2, %v279_v17, %v3052_v56  ;;  %v3091_v31 = vsel %vm277_vm2, %v287_v18, %v286_v61  ;;  %v510_v35 = vsel %vm3054_vm1, %v3068_v15, %v3080_v26 }
 0x145   :  { %v365_v32 = vpop.f32.mrb[1].mxu1  ;;  %v368_v36 = vadd.f32 %v363_v24, %v291_v28  ;;  %v292_v37 = vsel %vm3058_vm3, %v3088_v30, %v3091_v31  ;;  %v3102_v40 = vsel %vm277_vm2, %v506_v20, %v505_v5  ;;  %v3105_v41 = vsel %vm277_vm2, %v713_v27, %v712_v1 }
 0x146   :  { %v369_v42 = vadd.f32 %v365_v32, %v292_v37  ;;  %v511_v46 = vsel %vm3058_vm3, %v3071_v19, %v3102_v40  ;;  %v721_v48 = vrot.slane %v218_v2, 4  ;;  %v716_v49 = vrot.slane %v220_v7, 1 }
 0x147   :  { %v2297_v50 = vmul.f32 -1.442695, %v368_v36  ;;  %v724_v51 = vrot.slane %v220_v7, 4  ;;  %v931_v52 = vrot.slane %v218_v2, 2  ;;  %v939_v53 = vrot.slane %v218_v2, 3 }
 0x148   :  { %v3112_v55 = vsel %vm277_vm2, %v721_v48, %v720_v6  ;;  %v3115_v58 = vsel %vm277_vm2, %v716_v49, %v715_v8  ;;  %v933_v61 = vrot.slane %v3052_v56, 3  ;;  %v934_v3 = vrot.slane %v220_v7, 2 }
 0x149   :  { %2545 = vpow2.f32 %v2297_v50  ;;  %v728_v62 = vsel %vm3054_vm1, %v3105_v41, %v3112_v55  ;;  %v3123_v63 = vsel %vm277_vm2, %v724_v51, %v723_v10  ;;  %v3126_v1 = vsel %vm277_vm2, %v931_v52, %v930_v11 }
 0x14a   :  { %v729_v2 = vsel %vm3058_vm3, %v3115_v58, %v3123_v63  ;;  %v3133_v54 = vsel %vm277_vm2, %v939_v53, %v938_v60  ;;  %v941_v4 = vrot.slane %v3052_v56, 4  ;;  %v942_v6 = vrot.slane %v220_v7, 3 }
 0x14b   :  { %v946_v5 = vsel %vm3054_vm1, %v3126_v1, %v3133_v54  ;;  %v1148_v8 = vsel %vm3054_vm1, %v3133_v54, %v3126_v1  ;;  %v1342_v10 = vsel %vm3054_vm1, %v3112_v55, %v3105_v41  ;;  %v3149_v11 = vsel %vm277_vm2, %v934_v3, %v933_v61  ;;  %v3186_v3 = vpop.permute.xlu1 %400 }
 0x14c   :  { %v1343_v56 = vsel %vm3058_vm3, %v3123_v63, %v3115_v58  ;;  %v1536_v7 = vsel %vm3054_vm1, %v3080_v26, %v3068_v15  ;;  %v1537_v12 = vsel %vm3058_vm3, %v3102_v40, %v3071_v19  ;;  %v3164_v14 = vsel %vm277_vm2, %v942_v6, %v941_v4 }
 0x14d   :  { %v1730_v16 = vsel %vm3054_vm1, %v3077_v23, %v3074_v21  ;;  %v1731_v17 = vsel %vm3058_vm3, %v3091_v31, %v3088_v30  ;;  %v947_v18 = vsel %vm3058_vm3, %v3149_v11, %v3164_v14  ;;  %v1149_v20 = vsel %vm3058_vm3, %v3164_v14, %v3149_v11 }
 0x14e   :  { %2547 = vtanh.f32 %v369_v42  ;;  %v2298_v37 = vmul.f32 -1.442695, %v369_v42 }
 0x153   :  { %v2546_v24 = vpop.eup %2545 }
 0x154   :  { %v373_v27 = vadd.f32 1.0, %v2546_v24 }
 0x156   :  { %2549 = vrcp.f32 %v373_v27 }
 0x157   :  { %2551 = vpow2.f32 %v2298_v37 }
 0x158   :  { %v2548_v28 = vpop.eup %2547 }
 0x160   :  { %v2550_v32 = vpop.eup %2549 }
 0x161   :  { %v384_v36 = vmul.f32 %v2550_v32, %v2548_v28  ;;  %v2552_v48 = vpop.eup %2551  ;;  %v383_v50 = vmul.f32 0.0, %v2550_v32 }
 0x162   :  { %v380_v49 = vadd.f32 1.0, %v2552_v48 }
 0x163   :  { %386 = vrot.lane.b32.xlu0 %v384_v36, %s2826_s4 }
 0x164   :  { %2553 = vrcp.f32 %v380_v49  ;;  %v2827_v49 = vmov 6  }
 0x165   :  { %2539 = vset.pattern.permute.xlu1 %v2827_v49 }
 0x167   :  { %396 = vperm.xlu0 %2536, %v3032_v39  }
 0x16e   :  { %v2554_v53 = vpop.eup %2553 }
 0x1d5   :  { %v387_v51 = vpop.permute.xlu0 %386 }
 0x1d6   :  { %v389_v52 = vadd.f32 %v387_v51, %v383_v50  ;;  %v2828_v50 = vmov 1  }
 0x1d7   :  { %2538 = vset.pattern.permute.xlu0 %v2828_v50 }
 0x1d8   :  { %2555 = vtanh.f32 %v389_v52 }
 0x1e2   :  { %v2556_v60 = vpop.eup %2555 }
 0x1e3   :  { %v391_v61 = vmul.f32 %v2556_v60, %v2554_v53 }
 0x1e5   :  { %413 = vrot.lane.b32.xlu1 %v391_v61, %s2826_s4 }
 0x1e6   :  { %v3188_v4 = vpop.permute.xlu0 %396 }
 0x1e7   :  { %v403_v42 = vsel %vm251_vm4, %v3188_v4, %v3186_v3 }
 0x1e8   :  { %v409_v6 = vsub.f32 1.0, %v403_v42 }
 0x1e9   :  { %405 = vrot.lane.b32.xlu1 %v389_v52, %s2826_s4 }
 0x1ea   :  { %v410_v24 = vmul.f32 0.0, %v409_v6 }
 0x257   :  { %v414_v27 = vpop.permute.xlu1 %413 }
 0x258   :  { %v416_v28 = vmul.f32 %v414_v27, %v403_v42 }
 0x25a   :  { %v3195_v32 = vadd.f32 %v416_v28, %v410_v24 }
 0x25b   :  { %v406_v36 = vpop.permute.xlu1 %405 }
 0x25c   :  { %v408_v37 = vmul.f32 %v406_v36, %v403_v42  ;;  %2299 = vmatmul.mubr.msk.f32.vlgmr.msra.gmra.mrb[4].mxu0 %vm293_vm5, %v3195_v32 }
 0x25d   :  { %2420 = vmatpush1.bf16.msra.mxu0 %v2983_v13  ;;  %1015 = vmatprep.mubr.f32.mxu0 %v2823_v0 }
 0x25e   :  { %v411_v48 = vadd.f32 %v410_v24, %v408_v37  ;;  %2422 = vmatprep.subr.bf16.mxu0 %v2987_v22 }
 0x260   :  { %602 = vrot.lane.b32.xlu0 %v411_v48, %s2826_s4 }
 0x261   :  { %2424 = vmatpush1.bf16.msra.mxu0 %v2989_v25 }
 0x262   :  { %2426 = vmatprep.subr.bf16.mxu0 %v2992_v29 }
 0x264   :  { %615 = vperm.xlu0 %2538, %v3032_v39  }
 0x265   :  { %2428 = vmatpush1.bf16.msra.mxu0 %v2995_v33 }
 0x266   :  { %2430 = vmatprep.subr.bf16.mxu0 %v2999_v34 }
 0x269   :  { %2432 = vmatpush1.bf16.msra.mxu0 %v3005_v38 }
 0x26a   :  { %2450 = vmatprep.subr.bf16.mxu0 %v2981_v9 }
 0x2d2   :  { %v603_v37 = vpop.permute.xlu0 %602 }
 0x32f   :  { %v581_v51 = vpop.f32.mrb[4].mxu0 }
 0x330   :  { %v586_v52 = vadd.f32 %v581_v51, %v510_v35  ;;  %v583_v53 = vpop.f32.mrb[5].mxu0 }
 0x331   :  { %v587_v60 = vadd.f32 %v583_v53, %v511_v46 }
 0x332   :  { %v2300_v61 = vmul.f32 -1.442695, %v586_v52 }
 0x333   :  { %v2301_v35 = vmul.f32 -1.442695, %v587_v60 }
 0x334   :  { %2557 = vpow2.f32 %v2300_v61 }
 0x335   :  { %2559 = vtanh.f32 %v587_v60 }
 0x33e   :  { %v2558_v42 = vpop.eup %2557 }
 0x33f   :  { %v591_v6 = vadd.f32 1.0, %v2558_v42  ;;  %v2560_v24 = vpop.eup %2559  ;;  %v3224_v42 = vpop.permute.xlu0 %615 }
 0x341   :  { %2561 = vrcp.f32 %v591_v6 }
 0x342   :  { %2563 = vpow2.f32 %v2301_v35 }
 0x34b   :  { %v2562_v27 = vpop.eup %2561 }
 0x34c   :  { %v606_v28 = vmul.f32 %v2562_v27, %v2560_v24  ;;  %v2564_v36 = vpop.eup %2563  ;;  %v605_v50 = vmul.f32 %v2562_v27, %v603_v37 }
 0x34d   :  { %v598_v49 = vadd.f32 1.0, %v2564_v36 }
 0x34e   :  { %608 = vrot.lane.b32.xlu1 %v606_v28, %s2826_s4 }
 0x34f   :  { %2565 = vrcp.f32 %v598_v49 }
 0x352   :  { %619 = vperm.xlu1 %2539, %v3032_v39  }
 0x359   :  { %v2566_v52 = vpop.eup %2565 }
 0x3c0   :  { %v609_v46 = vpop.permute.xlu1 %608 }
 0x3c1   :  { %v611_v51 = vadd.f32 %v609_v46, %v605_v50 }
 0x3c3   :  { %2567 = vtanh.f32 %v611_v51  ;;  %624 = vrot.lane.b32.xlu0 %v611_v51, %s2826_s4  ;;  %v2830_v51 = vmov 5  }
 0x3c4   :  { %2541 = vset.pattern.permute.xlu0 %v2830_v51 }
 0x3cd   :  { %v2568_v53 = vpop.eup %2567 }
 0x3ce   :  { %v613_v61 = vmul.f32 %v2568_v53, %v2566_v52 }
 0x3d0   :  { %632 = vrot.lane.b32.xlu1 %v613_v61, %s2826_s4 }
 0x3d1   :  { %v3226_v6 = vpop.permute.xlu1 %619 }
 0x3d2   :  { %v622_v60 = vsel %vm251_vm4, %v3224_v42, %v3226_v6 }
 0x3d3   :  { %v628_v24 = vsub.f32 1.0, %v622_v60 }
 0x3d5   :  { %v629_v35 = vmul.f32 %v628_v24, %v411_v48  ;;  %v636_v49 = vmul.f32 %v628_v24, %v3195_v32  ;;  %v2829_v48 = vmov 2  }
 0x3d6   :  { %2540 = vset.pattern.permute.xlu1 %v2829_v48 }
 0x435   :  { %v625_v27 = vpop.permute.xlu0 %624 }
 0x436   :  { %v627_v28 = vmul.f32 %v625_v27, %v622_v60 }
 0x438   :  { %v630_v36 = vadd.f32 %v629_v35, %v627_v28 }
 0x43a   :  { %820 = vrot.lane.b32.xlu1 %v630_v36, %s2826_s4 }
 0x43e   :  { %833 = vperm.xlu1 %2540, %v3032_v39  }
 0x442   :  { %v633_v37 = vpop.permute.xlu1 %632 }
 0x443   :  { %v635_v50 = vmul.f32 %v633_v37, %v622_v60 }
 0x445   :  { %v3234_v46 = vadd.f32 %v636_v49, %v635_v50 }
 0x447   :  { %2302 = vmatmul.mubr.msk.f32.vlgmr.msra.gmra.mrb[2].mxu1 %vm293_vm5, %v3234_v46 }
 0x448   :  { %2436 = vmatpush1.bf16.msra.mxu1 %v2983_v13  ;;  %1217 = vmatprep.mubr.f32.mxu1 %v2823_v0 }
 0x449   :  { %2438 = vmatprep.subr.bf16.mxu1 %v2987_v22 }
 0x44c   :  { %2440 = vmatpush1.bf16.msra.mxu1 %v2989_v25 }
 0x44d   :  { %2442 = vmatprep.subr.bf16.mxu1 %v2992_v29 }
 0x450   :  { %2444 = vmatpush1.bf16.msra.mxu1 %v2995_v33 }
 0x451   :  { %2446 = vmatprep.subr.bf16.mxu1 %v2999_v34 }
 0x454   :  { %2448 = vmatpush1.bf16.msra.mxu1 %v3005_v38 }
 0x455   :  { %2466 = vmatprep.subr.bf16.mxu1 %v2981_v9 }
 0x4ac   :  { %v821_v48 = vpop.permute.xlu1 %820 }
 0x51a   :  { %v799_v52 = vpop.f32.mrb[2].mxu1 }
 0x51b   :  { %v804_v53 = vadd.f32 %v799_v52, %v728_v62  ;;  %v801_v61 = vpop.f32.mrb[3].mxu1 }
 0x51c   :  { %v805_v60 = vadd.f32 %v801_v61, %v729_v2 }
 0x51d   :  { %v2303_v24 = vmul.f32 -1.442695, %v804_v53 }
 0x51e   :  { %v2304_v62 = vmul.f32 -1.442695, %v805_v60 }
 0x51f   :  { %2569 = vpow2.f32 %v2303_v24 }
 0x520   :  { %2571 = vtanh.f32 %v805_v60 }
 0x529   :  { %v2570_v27 = vpop.eup %2569 }
 0x52a   :  { %v809_v28 = vadd.f32 1.0, %v2570_v27  ;;  %v2572_v35 = vpop.eup %2571 }
 0x52c   :  { %2573 = vrcp.f32 %v809_v28 }
 0x52d   :  { %2575 = vpow2.f32 %v2304_v62 }
 0x536   :  { %v2574_v37 = vpop.eup %2573 }
 0x537   :  { %v824_v49 = vmul.f32 %v2574_v37, %v2572_v35  ;;  %v2576_v50 = vpop.eup %2575  ;;  %v823_v52 = vmul.f32 %v2574_v37, %v821_v48  ;;  %v3264_v35 = vpop.permute.xlu1 %833 }
 0x538   :  { %v816_v51 = vadd.f32 1.0, %v2576_v50 }
 0x539   :  { %826 = vrot.lane.b32.xlu0 %v824_v49, %s2826_s4 }
 0x53a   :  { %2577 = vrcp.f32 %v816_v51 }
 0x53d   :  { %837 = vperm.xlu0 %2541, %v3032_v39  }
 0x544   :  { %v2578_v61 = vpop.eup %2577 }
 0x5ab   :  { %v827_v2 = vpop.permute.xlu0 %826 }
 0x5ac   :  { %v829_v53 = vadd.f32 %v827_v2, %v823_v52 }
 0x5ae   :  { %2579 = vtanh.f32 %v829_v53 }
 0x5b8   :  { %v2580_v24 = vpop.eup %2579 }
 0x5b9   :  { %v831_v27 = vmul.f32 %v2580_v24, %v2578_v61  ;;  %v2832_v61 = vmov 3  }
 0x5ba   :  { %2542 = vset.pattern.permute.xlu0 %v2832_v61 }
 0x5bb   :  { %850 = vrot.lane.b32.xlu1 %v831_v27, %s2826_s4 }
 0x5bc   :  { %v3262_v28 = vpop.permute.xlu0 %837 }
 0x5bd   :  { %v840_v60 = vsel %vm251_vm4, %v3264_v35, %v3262_v28 }
 0x5be   :  { %v846_v37 = vsub.f32 1.0, %v840_v60 }
 0x5bf   :  { %842 = vrot.lane.b32.xlu1 %v829_v53, %s2826_s4 }
 0x5c0   :  { %v854_v62 = vmul.f32 %v846_v37, %v3234_v46  ;;  %v847_v52 = vmul.f32 %v846_v37, %v630_v36  ;;  %v2831_v36 = vmov 4  }
 0x5c1   :  { %2543 = vset.pattern.permute.xlu1 %v2831_v36 }
 0x62d   :  { %v851_v49 = vpop.permute.xlu1 %850 }
 0x62e   :  { %v853_v50 = vmul.f32 %v851_v49, %v840_v60 }
 0x630   :  { %v3271_v48 = vadd.f32 %v854_v62, %v853_v50 }
 0x631   :  { %v843_v51 = vpop.permute.xlu1 %842 }
 0x632   :  { %v845_v2 = vmul.f32 %v843_v51, %v840_v60  ;;  %2305 = vmatmul.mubr.msk.f32.vlgmr.msra.gmra.mrb[6].mxu0 %vm293_vm5, %v3271_v48 }
 0x633   :  { %2452 = vmatpush1.bf16.msra.mxu0 %v2983_v13  ;;  %1411 = vmatprep.mubr.f32.mxu0 %v2823_v0 }
 0x634   :  { %v848_v53 = vadd.f32 %v847_v52, %v845_v2  ;;  %2454 = vmatprep.subr.bf16.mxu0 %v2987_v22 }
 0x636   :  { %1038 = vrot.lane.b32.xlu0 %v848_v53, %s2826_s4 }
 0x637   :  { %2456 = vmatpush1.bf16.msra.mxu0 %v2989_v25 }
 0x638   :  { %2458 = vmatprep.subr.bf16.mxu0 %v2992_v29 }
 0x63a   :  { %1051 = vperm.xlu0 %2542, %v3032_v39  }
 0x63b   :  { %2460 = vmatpush1.bf16.msra.mxu0 %v2995_v33 }
 0x63c   :  { %2462 = vmatprep.subr.bf16.mxu0 %v2999_v34 }
 0x63e   :  { %2544 = vset.pattern.permute.xlu0 %v2831_v36 }
 0x63f   :  { %2464 = vmatpush1.bf16.msra.mxu0 %v3005_v38 }
 0x640   :  { %2482 = vmatprep.subr.bf16.mxu0 %v2981_v9 }
 0x6a8   :  { %v1039_v36 = vpop.permute.xlu0 %1038 }
 0x705   :  { %v1017_v24 = vpop.f32.mrb[6].mxu0 }
 0x706   :  { %v1022_v27 = vadd.f32 %v1017_v24, %v946_v5  ;;  %v1019_v60 = vpop.f32.mrb[7].mxu0 }
 0x707   :  { %v1023_v9 = vadd.f32 %v1019_v60, %v947_v18 }
 0x708   :  { %v2306_v37 = vmul.f32 -1.442695, %v1022_v27 }
 0x709   :  { %v2307_v5 = vmul.f32 -1.442695, %v1023_v9 }
 0x70a   :  { %2581 = vpow2.f32 %v2306_v37 }
 0x70b   :  { %2583 = vtanh.f32 %v1023_v9 }
 0x714   :  { %v2582_v49 = vpop.eup %2581 }
 0x715   :  { %v1027_v62 = vadd.f32 1.0, %v2582_v49  ;;  %v2584_v50 = vpop.eup %2583 }
 0x717   :  { %2585 = vrcp.f32 %v1027_v62  ;;  %v3300_v62 = vpop.permute.xlu0 %1051 }
 0x718   :  { %2587 = vpow2.f32 %v2307_v5 }
 0x721   :  { %v2586_v51 = vpop.eup %2585 }
 0x722   :  { %v1042_v52 = vmul.f32 %v2586_v51, %v2584_v50  ;;  %v2588_v2 = vpop.eup %2587  ;;  %v1041_v24 = vmul.f32 %v2586_v51, %v1039_v36 }
 0x723   :  { %v1034_v61 = vadd.f32 1.0, %v2588_v2 }
 0x724   :  { %1044 = vrot.lane.b32.xlu1 %v1042_v52, %s2826_s4 }
 0x725   :  { %2589 = vrcp.f32 %v1034_v61 }
 0x728   :  { %1055 = vperm.xlu1 %2543, %v3032_v39  }
 0x72f   :  { %v2590_v60 = vpop.eup %2589 }
 0x796   :  { %v1045_v18 = vpop.permute.xlu1 %1044 }
 0x797   :  { %v1047_v27 = vadd.f32 %v1045_v18, %v1041_v24 }
 0x799   :  { %2591 = vtanh.f32 %v1047_v27  ;;  %1060 = vrot.lane.b32.xlu0 %v1047_v27, %s2826_s4 }
 0x7a3   :  { %v2592_v37 = vpop.eup %2591 }
 0x7a4   :  { %v1049_v49 = vmul.f32 %v2592_v37, %v2590_v60 }
 0x7a6   :  { %1068 = vrot.lane.b32.xlu1 %v1049_v49, %s2826_s4 }
 0x7a7   :  { %v3302_v39 = vpop.permute.xlu1 %1055 }
 0x7a8   :  { %v1058_v9 = vsel %vm251_vm4, %v3300_v62, %v3302_v39 }
 0x7a9   :  { %v1064_v50 = vsub.f32 1.0, %v1058_v9 }
 0x7ab   :  { %v1065_v5 = vmul.f32 %v1064_v50, %v848_v53  ;;  %v1072_v61 = vmul.f32 %v1064_v50, %v3271_v48 }
 0x80b   :  { %v1061_v51 = vpop.permute.xlu0 %1060 }
 0x80c   :  { %v1063_v52 = vmul.f32 %v1061_v51, %v1058_v9 }
 0x80e   :  { %v1066_v2 = vadd.f32 %v1065_v5, %v1063_v52 }
 0x810   :  { %1240 = vrot.lane.b32.xlu1 %v1066_v2, %s2826_s4 }
 0x818   :  { %v1069_v36 = vpop.permute.xlu1 %1068 }
 0x819   :  { %v1071_v24 = vmul.f32 %v1069_v36, %v1058_v9 }
 0x81b   :  { %v3310_v18 = vadd.f32 %v1072_v61, %v1071_v24 }
 0x81d   :  { %2308 = vmatmul.mubr.msk.f32.vlgmr.msra.gmra.mrb[4].mxu1 %vm293_vm5, %v3310_v18 }
 0x81e   :  { %2468 = vmatpush1.bf16.msra.mxu1 %v2983_v13  ;;  %1605 = vmatprep.mubr.f32.mxu1 %v2823_v0 }
 0x81f   :  { %2470 = vmatprep.subr.bf16.mxu1 %v2987_v22 }
 0x822   :  { %2472 = vmatpush1.bf16.msra.mxu1 %v2989_v25 }
 0x823   :  { %2474 = vmatprep.subr.bf16.mxu1 %v2992_v29 }
 0x826   :  { %2476 = vmatpush1.bf16.msra.mxu1 %v2995_v33 }
 0x827   :  { %2478 = vmatprep.subr.bf16.mxu1 %v2999_v34 }
 0x82a   :  { %2480 = vmatpush1.bf16.msra.mxu1 %v3005_v38 }
 0x8f0   :  { %v1219_v53 = vpop.f32.mrb[4].mxu1 }
 0x8f1   :  { %v1224_v27 = vadd.f32 %v1219_v53, %v1148_v8  ;;  %v1221_v60 = vpop.f32.mrb[5].mxu1  ;;  %v1241_v8 = vpop.permute.xlu1 %1240 }
 0x8f2   :  { %v1225_v37 = vadd.f32 %v1221_v60, %v1149_v20 }
 0x8f3   :  { %v2309_v49 = vmul.f32 -1.442695, %v1224_v27  ;;  %v1252_v27 = vsel %vm251_vm4, %v3302_v39, %v3300_v62 }
 0x8f4   :  { %v2310_v1 = vmul.f32 -1.442695, %v1225_v37  ;;  %v1258_v60 = vsub.f32 1.0, %v1252_v27 }
 0x8f5   :  { %2593 = vpow2.f32 %v2309_v49 }
 0x8f6   :  { %2595 = vtanh.f32 %v1225_v37  ;;  %v1259_v49 = vmul.f32 %v1258_v60, %v1066_v2 }
 0x8ff   :  { %v2594_v9 = vpop.eup %2593 }
 0x900   :  { %v1229_v50 = vadd.f32 1.0, %v2594_v9  ;;  %v2596_v51 = vpop.eup %2595 }
 0x902   :  { %2597 = vrcp.f32 %v1229_v50 }
 0x903   :  { %2599 = vpow2.f32 %v2310_v1 }
 0x90c   :  { %v2598_v52 = vpop.eup %2597 }
 0x90d   :  { %v1244_v5 = vmul.f32 %v2598_v52, %v2596_v51  ;;  %v2600_v54 = vpop.eup %2599  ;;  %v1243_v61 = vmul.f32 %v2598_v52, %v1241_v8  ;;  %v1266_v52 = vmul.f32 %v1258_v60, %v3310_v18 }
 0x90e   :  { %v1236_v36 = vadd.f32 1.0, %v2600_v54 }
 0x90f   :  { %1246 = vrot.lane.b32.xlu0 %v1244_v5, %s2826_s4 }
 0x910   :  { %2601 = vrcp.f32 %v1236_v36 }
 0x91a   :  { %v2602_v14 = vpop.eup %2601 }
 0x981   :  { %v1247_v24 = vpop.permute.xlu0 %1246 }
 0x982   :  { %v1249_v11 = vadd.f32 %v1247_v24, %v1243_v61 }
 0x984   :  { %2603 = vtanh.f32 %v1249_v11  ;;  %1254 = vrot.lane.b32.xlu0 %v1249_v11, %s2826_s4  ;;  %v1446_v11 = vsel %vm251_vm4, %v3262_v28, %v3264_v35 }
 0x98e   :  { %v2604_v20 = vpop.eup %2603 }
 0x98f   :  { %v1251_v53 = vmul.f32 %v2604_v20, %v2602_v14  ;;  %v1452_v14 = vsub.f32 1.0, %v1446_v11 }
 0x991   :  { %1262 = vrot.lane.b32.xlu1 %v1251_v53, %s2826_s4 }
 0x9f6   :  { %v1255_v37 = vpop.permute.xlu0 %1254 }
 0x9f7   :  { %v1257_v9 = vmul.f32 %v1255_v37, %v1252_v27 }
 0x9f9   :  { %v1260_v50 = vadd.f32 %v1259_v49, %v1257_v9 }
 0x9fb   :  { %1434 = vrot.lane.b32.xlu1 %v1260_v50, %s2826_s4  ;;  %v1453_v53 = vmul.f32 %v1452_v14, %v1260_v50 }
 0xa03   :  { %v1263_v51 = vpop.permute.xlu1 %1262 }
 0xa04   :  { %v1265_v5 = vmul.f32 %v1263_v51, %v1252_v27 }
 0xa06   :  { %v3341_v1 = vadd.f32 %v1266_v52, %v1265_v5 }
 0xa08   :  { %2311 = vmatmul.mubr.msk.f32.vlgmr.msra.gmra.mrb[8].mxu0 %vm293_vm5, %v3341_v1  ;;  %v1460_v49 = vmul.f32 %v1452_v14, %v3341_v1 }
 0xa09   :  { %2484 = vmatpush1.bf16.msra.mxu0 %v2983_v13  ;;  %1799 = vmatprep.mubr.f32.mxu0 %v2823_v0 }
 0xa0a   :  { %2486 = vmatprep.subr.bf16.mxu0 %v2987_v22 }
 0xa0d   :  { %2488 = vmatpush1.bf16.msra.mxu0 %v2989_v25 }
 0xa0e   :  { %2490 = vmatprep.subr.bf16.mxu0 %v2992_v29 }
 0xa11   :  { %2492 = vmatpush1.bf16.msra.mxu0 %v2995_v33 }
 0xa12   :  { %2494 = vmatprep.subr.bf16.mxu0 %v2999_v34 }
 0xa15   :  { %2496 = vmatpush1.bf16.msra.mxu0 %v3005_v38 }
 0xadb   :  { %v1413_v2 = vpop.f32.mrb[8].mxu0 }
 0xadc   :  { %v1418_v13 = vadd.f32 %v1413_v2, %v1342_v10  ;;  %v1415_v0 = vpop.f32.mrb[9].mxu0  ;;  %v1435_v10 = vpop.permute.xlu1 %1434 }
 0xadd   :  { %v1419_v22 = vadd.f32 %v1415_v0, %v1343_v56 }
 0xade   :  { %v2312_v25 = vmul.f32 -1.442695, %v1418_v13 }
 0xadf   :  { %v2313_v41 = vmul.f32 -1.442695, %v1419_v22 }
 0xae0   :  { %2605 = vpow2.f32 %v2312_v25 }
 0xae1   :  { %2607 = vtanh.f32 %v1419_v22 }
 0xaea   :  { %v2606_v29 = vpop.eup %2605 }
 0xaeb   :  { %v1423_v33 = vadd.f32 1.0, %v2606_v29  ;;  %v2608_v34 = vpop.eup %2607 }
 0xaed   :  { %2609 = vrcp.f32 %v1423_v33 }
 0xaee   :  { %2611 = vpow2.f32 %v2313_v41 }
 0xaf7   :  { %v2610_v38 = vpop.eup %2609 }
 0xaf8   :  { %v1438_v54 = vmul.f32 %v2610_v38, %v2608_v34  ;;  %v2612_v55 = vpop.eup %2611  ;;  %v1437_v36 = vmul.f32 %v2610_v38, %v1435_v10 }
 0xaf9   :  { %v1430_v8 = vadd.f32 1.0, %v2612_v55  ;;  %v1640_v55 = vsel %vm251_vm4, %v3226_v6, %v3224_v42 }
 0xafa   :  { %1440 = vrot.lane.b32.xlu0 %v1438_v54, %s2826_s4  ;;  %v1646_v10 = vsub.f32 1.0, %v1640_v55 }
 0xafb   :  { %2613 = vrcp.f32 %v1430_v8 }
 0xb05   :  { %v2614_v63 = vpop.eup %2613 }
 0xb6c   :  { %v1441_v61 = vpop.permute.xlu0 %1440 }
 0xb6d   :  { %v1443_v58 = vadd.f32 %v1441_v61, %v1437_v36 }
 0xb6f   :  { %2615 = vtanh.f32 %v1443_v58  ;;  %1448 = vrot.lane.b32.xlu0 %v1443_v58, %s2826_s4 }
 0xb79   :  { %v2616_v56 = vpop.eup %2615 }
 0xb7a   :  { %v1445_v24 = vmul.f32 %v2616_v56, %v2614_v63 }
 0xb7c   :  { %1456 = vrot.lane.b32.xlu1 %v1445_v24, %s2826_s4 }
 0xbe1   :  { %v1449_v20 = vpop.permute.xlu0 %1448 }
 0xbe2   :  { %v1451_v27 = vmul.f32 %v1449_v20, %v1446_v11 }
 0xbe4   :  { %v1454_v60 = vadd.f32 %v1453_v53, %v1451_v27 }
 0xbe6   :  { %1628 = vrot.lane.b32.xlu1 %v1454_v60, %s2826_s4  ;;  %v1647_v36 = vmul.f32 %v1646_v10, %v1454_v60 }
 0xbee   :  { %v1457_v37 = vpop.permute.xlu1 %1456 }
 0xbef   :  { %v1459_v9 = vmul.f32 %v1457_v37, %v1446_v11 }
 0xbf1   :  { %v3372_v51 = vadd.f32 %v1460_v49, %v1459_v9 }
 0xbf3   :  { %2314 = vmatmul.mubr.msk.f32.vlgmr.msra.gmra.mrb[6].mxu1 %vm293_vm5, %v3372_v51  ;;  %v1654_v56 = vmul.f32 %v1646_v10, %v3372_v51 }
 0xcc6   :  { %v1607_v52 = vpop.f32.mrb[6].mxu1 }
 0xcc7   :  { %v1612_v50 = vadd.f32 %v1607_v52, %v1536_v7  ;;  %v1609_v5 = vpop.f32.mrb[7].mxu1  ;;  %v1629_v7 = vpop.permute.xlu1 %1628 }
 0xcc8   :  { %v1613_v2 = vadd.f32 %v1609_v5, %v1537_v12 }
 0xcc9   :  { %v2315_v13 = vmul.f32 -1.442695, %v1612_v50  ;;  %v2834_v50 = vmov 1966171168  }
 0xcca   :  { %v2316_v15 = vmul.f32 -1.442695, %v1613_v2  ;;  %v430_v5 = vunpack.c.l.s4 %v2834_v50 }
 0xccb   :  { %2617 = vpow2.f32 %v2315_v13 }
 0xccc   :  { %2619 = vtanh.f32 %v1613_v2 }
 0xcd5   :  { %v2618_v0 = vpop.eup %2617 }
 0xcd6   :  { %v1617_v22 = vadd.f32 1.0, %v2618_v0  ;;  %v2620_v25 = vpop.eup %2619  ;;  %v431_v0 = vunpack.c.0.s8 %v430_v5 }
 0xcd8   :  { %2621 = vrcp.f32 %v1617_v22 }
 0xcd9   :  { %2623 = vpow2.f32 %v2316_v15  ;;  %v3433_v15 = vsub.s32 %v431_v0, %v3035_v43 }
 0xce2   :  { %v2622_v29 = vpop.eup %2621 }
 0xce3   :  { %v1632_v33 = vmul.f32 %v2622_v29, %v2620_v25  ;;  %v2624_v26 = vpop.eup %2623  ;;  %v1631_v38 = vmul.f32 %v2622_v29, %v1629_v7  ;;  %v3430_v29 = vstv %s3708_s11 }
 0xce4   :  { %v1624_v34 = vadd.f32 1.0, %v2624_v26  ;;  %v419_v26 = vmul.f32 %v3430_v29, %v3195_v32 }
 0xce5   :  { %1634 = vrot.lane.b32.xlu0 %v1632_v33, %s2826_s4 }
 0xce6   :  { %2625 = vrcp.f32 %v1624_v34 }
 0xcf0   :  { %v2626_v40 = vpop.eup %2625 }
 0xd57   :  { %v1635_v54 = vpop.permute.xlu0 %1634 }
 0xd58   :  { %v1637_v19 = vadd.f32 %v1635_v54, %v1631_v38 }
 0xd5a   :  { %2627 = vtanh.f32 %v1637_v19  ;;  %1642 = vrot.lane.b32.xlu0 %v1637_v19, %s2826_s4  ;;  %v856_v19 = vmul.f32 %v3271_v48, %v3430_v29 }
 0xd64   :  { %v2628_v12 = vpop.eup %2627 }
 0xd65   :  { %v1639_v41 = vmul.f32 %v2628_v12, %v2626_v40 }
 0xd67   :  { %1650 = vrot.lane.b32.xlu1 %v1639_v41, %s2826_s4 }
 0xdcc   :  { %v1643_v8 = vpop.permute.xlu0 %1642 }
 0xdcd   :  { %v1645_v61 = vmul.f32 %v1643_v8, %v1640_v55 }
 0xdcf   :  { %v1648_v58 = vadd.f32 %v1647_v36, %v1645_v61 }
 0xdd1   :  { %1822 = vrot.lane.b32.xlu1 %v1648_v58, %s2826_s4 }
 0xdd9   :  { %v1651_v63 = vpop.permute.xlu1 %1650 }
 0xdda   :  { %v1653_v24 = vmul.f32 %v1651_v63, %v1640_v55 }
 0xddc   :  { %v3395_v11 = vadd.f32 %v1654_v56, %v1653_v24 }
 0xdde   :  { %2317 = vmatmul.mubr.msk.f32.vlgmr.msra.gmra.mrb[10].mxu0 %vm293_vm5, %v3395_v11 }
 0xe43   :  { %v1823_v2 = vpop.permute.xlu1 %1822 }
 0xeb1   :  { %v1801_v14 = vpop.f32.mrb[10].mxu0 }
 0xeb2   :  { %v1806_v20 = vadd.f32 %v1801_v14, %v1730_v16  ;;  %v1803_v53 = vpop.f32.mrb[11].mxu0  ;;  %v3412_v16 = vstv %s117_s0 }
 0xeb3   :  { %v1807_v27 = vadd.f32 %v1803_v53, %v1731_v17  ;;  %v421_v59 = vmul.f32 %v3412_v16, %v3195_v32  ;;  %v857_v30 = vmul.f32 %v3271_v48, %v3412_v16  ;;  %v1269_v31 = vmul.f32 %v3341_v1, %v3412_v16 }
 0xeb4   :  { %v2318_v60 = vmul.f32 -1.442695, %v1806_v20  ;;  %v1657_v17 = vmul.f32 %v3395_v11, %v3412_v16  ;;  %v1268_v53 = vmul.f32 %v3341_v1, %v3430_v29  ;;  %v1075_v50 = vmul.f32 %v3310_v18, %v3412_v16 }
 0xeb5   :  { %v2319_v9 = vmul.f32 -1.442695, %v1807_v27  ;;  %v1463_v0 = vmul.f32 %v3372_v51, %v3412_v16 }
 0xeb6   :  { %2629 = vpow2.f32 %v2318_v60 }
 0xeb7   :  { %2631 = vtanh.f32 %v1807_v27 }
 0xec0   :  { %v2630_v37 = vpop.eup %2629 }
 0xec1   :  { %v1811_v49 = vadd.f32 1.0, %v2630_v37  ;;  %v2632_v57 = vpop.eup %2631 }
 0xec3   :  { %2633 = vrcp.f32 %v1811_v49 }
 0xec4   :  { %2635 = vpow2.f32 %v2319_v9 }
 0xecd   :  { %v2634_v21 = vpop.eup %2633 }
 0xece   :  { %v1826_v23 = vmul.f32 %v2634_v21, %v2632_v57  ;;  %v2636_v52 = vpop.eup %2635  ;;  %v1825_v22 = vmul.f32 %v2634_v21, %v1823_v2 }
 0xecf   :  { %v1818_v13 = vadd.f32 1.0, %v2636_v52 }
 0xed0   :  { %1828 = vrot.lane.b32.xlu0 %v1826_v23, %s2826_s4 }
 0xed1   :  { %2637 = vrcp.f32 %v1818_v13 }
 0xed4   :  { %423 = vrot.lane.b32.xlu0 %v421_v59, %s2833_s25  ;;  %v1656_v59 = vmul.f32 %v3395_v11, %v3430_v29 }
 0xed8   :  { %859 = vrot.lane.b32.xlu0 %v857_v30, %s2833_s25  ;;  %v639_v30 = vmul.f32 %v3234_v46, %v3412_v16 }
 0xedb   :  { %v2638_v61 = vpop.eup %2637 }
 0xedc   :  { %1271 = vrot.lane.b32.xlu0 %v1269_v31, %s2833_s25 }
 0xee0   :  { %1659 = vrot.lane.b32.xlu0 %v1657_v17, %s2833_s25 }
 0xf42   :  { %v1829_v25 = vpop.permute.xlu0 %1828 }
 0xf43   :  { %v1831_v33 = vadd.f32 %v1829_v25, %v1825_v22 }
 0xf45   :  { %2639 = vtanh.f32 %v1831_v33 }
 0xf46   :  { %v424_v7 = vpop.permute.xlu0 %423 }
 0xf47   :  { %v426_v34 = vadd.f32 %v424_v7, %v419_v26 }
 0xf49   :  { %v427_v38 = vmul.f32 %v426_v34, %v3188_v4  ;;  %v463_v54 = vrot.slane %v426_v34, %v3433_v15 }
 0xf4a   :  { %v860_v40 = vpop.permute.xlu0 %859 }
 0xf4b   :  { %v435_v12 = vrot.slane %v427_v38, %v3433_v15  ;;  %v471_v41 = vrot.slane %v463_v54, %v3433_v15  ;;  %v862_v55 = vadd.f32 %v860_v40, %v856_v19  ;;  %v464_v58 = vcombine.high %v463_v54, %v463_v54 }
 0xf4c   :  { %v1834_v40 = vsel %vm251_vm4, %v3186_v3, %v3188_v4 }
 0xf4d   :  { %v436_v10 = vcombine.high %v435_v12, %v435_v12  ;;  %v443_v8 = vrot.slane %v435_v12, %v3433_v15  ;;  %v863_v32 = vmul.f32 %v862_v55, %v3264_v35  ;;  %v898_v36 = vrot.slane %v862_v55, %v3433_v15 }
 0xf4e   :  { %v1272_v63 = vpop.permute.xlu0 %1271  ;;  %v482_v56 = vrot.slane %v471_v41, %v3040_v45  ;;  %v478_v21 = vrot.slane %v464_v58, %v3433_v15  ;;  %v1840_v41 = vsub.f32 1.0, %v1834_v40 }
 0xf4f   :  { %v2640_v48 = vpop.eup %2639  ;;  %v450_v24 = vrot.slane %v436_v10, %v3433_v15  ;;  %v871_v14 = vrot.slane %v863_v32, %v3433_v15  ;;  %v906_v20 = vrot.slane %v898_v36, %v3433_v15  ;;  %454 = vst.msk [vmem:[#allocation13] sm:$0x1] %vm453_vm6, %v443_v8  ;;  %v899_v49 = vcombine.high %v898_v36, %v898_v36 }
 0xf50   :  { %487 = vrot.lane.b32.xlu0 %v482_v56, %s2833_s25  ;;  %v1833_v35 = vmul.f32 %v2640_v48, %v2638_v61  ;;  %v3457_v57 = vadd.f32 %v1272_v63, %v1268_v53  ;;  %v486_v9 = vrot.slane %v478_v21, %v3040_v45  ;;  %v1841_v10 = vmul.f32 %v1840_v41, %v3395_v11 }
 0xf51   :  { %v872_v27 = vcombine.high %v871_v14, %v871_v14  ;;  %v879_v60 = vrot.slane %v871_v14, %v3433_v15  ;;  %v917_v37 = vrot.slane %v906_v20, %v3040_v45  ;;  %455 = vst.msk [vmem:[#allocation13 + $0x8] sm:$0x1] %vm453_vm6, %v450_v24  ;;  %v913_v52 = vrot.slane %v899_v49, %v3433_v15 }
 0xf52   :  { %1836 = vrot.lane.b32.xlu1 %v1833_v35, %s2826_s4  ;;  %v1660_v1 = vpop.permute.xlu0 %1659  ;;  %v1310_v31 = vrot.slane %v3457_v57, %v3433_v15  ;;  %v638_v61 = vmul.f32 %v3234_v46, %v3430_v29  ;;  %v1074_v11 = vmul.f32 %v3310_v18, %v3430_v29  ;;  %v1462_v18 = vmul.f32 %v3372_v51, %v3430_v29 }
 0xf53   :  { %v886_v23 = vrot.slane %v872_v27, %v3433_v15  ;;  %889 = vst.msk [vmem:[#allocation13 + $0x2] sm:$0x1] %vm453_vm6, %v879_v60  ;;  %v3471_v17 = vadd.f32 %v1660_v1, %v1656_v59  ;;  %v921_v13 = vrot.slane %v913_v52, %v3040_v45 }
 0xf54   :  { %922 = vrot.lane.b32.xlu0 %v917_v37, %s2833_s25  ;;  %v1318_v5 = vrot.slane %v1310_v31, %v3433_v15  ;;  %v1311_v22 = vcombine.high %v1310_v31, %v1310_v31 }
 0xf55   :  { %890 = vst.msk [vmem:[#allocation13 + $0xa] sm:$0x1] %vm453_vm6, %v886_v23  ;;  %v1698_v2 = vrot.slane %v3471_v17, %v3433_v15 }
 0xf56   :  { %641 = vrot.lane.b32.xlu1 %v639_v30, %s2833_s25  ;;  %v1329_v33 = vrot.slane %v1318_v5, %v3040_v45  ;;  %v1325_v34 = vrot.slane %v1311_v22, %v3433_v15 }
 0xf57   :  { %v1706_v25 = vrot.slane %v1698_v2, %v3433_v15  ;;  %v1699_v26 = vcombine.high %v1698_v2, %v1698_v2 }
 0xf58   :  { %489 = vrot.lane.b32.xlu0 %v486_v9, %s2833_s25  ;;  %v1333_v38 = vrot.slane %v1325_v34, %v3040_v45 }
 0xf59   :  { %v1717_v7 = vrot.slane %v1706_v25, %v3040_v45  ;;  %v1713_v54 = vrot.slane %v1699_v26, %v3433_v15 }
 0xf5a   :  { %1077 = vrot.lane.b32.xlu1 %v1075_v50, %s2833_s25 }
 0xf5b   :  { %v1721_v19 = vrot.slane %v1713_v54, %v3040_v45 }
 0xf5c   :  { %924 = vrot.lane.b32.xlu0 %v921_v13, %s2833_s25 }
 0xf5e   :  { %1465 = vrot.lane.b32.xlu1 %v1463_v0, %s2833_s25 }
 0xf60   :  { %1334 = vrot.lane.b32.xlu0 %v1329_v33, %s2833_s25 }
 0xf64   :  { %1722 = vrot.lane.b32.xlu0 %v1717_v7, %s2833_s25 }
 0xf68   :  { %1336 = vrot.lane.b32.xlu0 %v1333_v38, %s2833_s25 }
 0xf6c   :  { %1724 = vrot.lane.b32.xlu0 %v1721_v19, %s2833_s25 }
 0xfc2   :  { %v488_v12 = vpop.permute.xlu0 %487 }
 0xfc3   :  { %494 = vst.msk [vmem:[#allocation13 + $0x7] sm:$0x1] %vm493_vm7, %v488_v12 }
 0xfc4   :  { %v1837_v55 = vpop.permute.xlu1 %1836 }
 0xfc5   :  { %v1839_v8 = vmul.f32 %v1837_v55, %v1834_v40 }
 0xfc6   :  { %v923_v32 = vpop.permute.xlu0 %922 }
 0xfc7   :  { %v3505_v36 = vadd.f32 %v1841_v10, %v1839_v8  ;;  %928 = vst.msk [vmem:[#allocation13 + $0x5] sm:$0x1] %vm493_vm7, %v923_v32  ;;  %v1663_v8 = vmul.f32 %v3471_v17, %v3226_v6  ;;  %v1275_v6 = vmul.f32 %v3457_v57, %v3302_v39 }
 0xfc8   :  { %v642_v58 = vpop.permute.xlu1 %641 }
 0xfc9   :  { %v644_v63 = vadd.f32 %v642_v58, %v638_v61  ;;  %v1844_v4 = vmul.f32 %v3505_v36, %v3412_v16  ;;  %v1843_v32 = vmul.f32 %v3505_v36, %v3430_v29  ;;  %v1994_v58 = vld [vmem:[#allocation10] sm:$0xff]  ;;  %v1671_v17 = vrot.slane %v1663_v8, %v3433_v15 }
 0xfca   :  { %v490_v56 = vpop.permute.xlu0 %489 }
 0xfcb   :  { %v645_v48 = vmul.f32 %v644_v63, %v3224_v42  ;;  %v680_v24 = vrot.slane %v644_v63, %v3433_v15  ;;  %495 = vst.msk [vmem:[#allocation13 + $0xf] sm:$0x1] %vm493_vm7, %v490_v56  ;;  %1846 = vrot.lane.b32.xlu1 %v1844_v4, %s2833_s25  ;;  %v1995_v63 = vld [vmem:[#allocation10 + $0x8] sm:$0xff]  ;;  %v2086_v4 = vld [vmem:[%s3706_s9] sm:$0xff] }
 0xfcc   :  { %v1078_v14 = vpop.permute.xlu1 %1077 }
 0xfcd   :  { %v653_v46 = vrot.slane %v645_v48, %v3433_v15  ;;  %v688_v20 = vrot.slane %v680_v24, %v3433_v15  ;;  %v1080_v53 = vadd.f32 %v1078_v14, %v1074_v11  ;;  %v681_v35 = vcombine.high %v680_v24, %v680_v24  ;;  %v2087_v24 = vld [vmem:[%s3706_s9 + $0x8] sm:$0xff]  ;;  %v1996_v11 = vld [vmem:[#allocation10 + $0x10] sm:$0xff] }
 0xfce   :  { %v925_v27 = vpop.permute.xlu0 %924  ;;  %v2497_v48 = vpack.c.bf16 %v1995_v63, %v1994_v58  ;;  %v1997_v14 = vld [vmem:[#allocation10 + $0x18] sm:$0xff]  ;;  %v2505_v36 = vpack.c.bf16 %v2087_v24, %v2086_v4 }
 0xfcf   :  { %v654_v60 = vcombine.high %v653_v46, %v653_v46  ;;  %v661_v42 = vrot.slane %v653_v46, %v3433_v15  ;;  %v1081_v37 = vmul.f32 %v1080_v53, %v3300_v62  ;;  %v1116_v49 = vrot.slane %v1080_v53, %v3433_v15  ;;  %929 = vst.msk [vmem:[#allocation13 + $0xd] sm:$0x1] %vm493_vm7, %v925_v27  ;;  %v2089_v27 = vld [vmem:[%s3706_s9 + $0x18] sm:$0xff] }
 0xfd0   :  { %v1466_v21 = vpop.permute.xlu1 %1465  ;;  %v699_v23 = vrot.slane %v688_v20, %v3040_v45  ;;  %v695_v50 = vrot.slane %v681_v35, %v3433_v15  ;;  %v2501_v46 = vpack.c.bf16 %v1997_v14, %v1996_v11  ;;  %2498 = vmatprep.subr.bf16.mxu1 %v2497_v48  ;;  %2506 = vmatprep.subr.bf16.mxu0 %v2505_v36  ;;  %v2088_v35 = vld [vmem:[%s3706_s9 + $0x10] sm:$0xff] }
 0xfd1   :  { %v668_v1 = vrot.slane %v654_v60, %v3433_v15  ;;  %v1089_v59 = vrot.slane %v1081_v37, %v3433_v15  ;;  %v1124_v30 = vrot.slane %v1116_v49, %v3433_v15  ;;  %671 = vst.msk [vmem:[#allocation13 + $0x1] sm:$0x1] %vm453_vm6, %v661_v42  ;;  %v1468_v31 = vadd.f32 %v1466_v21, %v1462_v18 }
 0xfd2   :  { %v1335_v62 = vpop.permute.xlu0 %1334  ;;  %704 = vrot.lane.b32.xlu1 %v699_v23, %s2833_s25  ;;  %v1117_v5 = vcombine.high %v1116_v49, %v1116_v49  ;;  %v703_v25 = vrot.slane %v695_v50, %v3040_v45  ;;  %2500 = vmatpush3.bf16.msra.mxu1 %v2497_v48  ;;  %v1679_v42 = vrot.slane %v1671_v17, %v3433_v15 }
 0xfd3   :  { %v1090_v9 = vcombine.high %v1089_v59, %v1089_v59  ;;  %v1097_v52 = vrot.slane %v1089_v59, %v3433_v15  ;;  %672 = vst.msk [vmem:[#allocation13 + $0x9] sm:$0x1] %vm453_vm6, %v668_v1  ;;  %v1135_v51 = vrot.slane %v1124_v30, %v3040_v45  ;;  %v1469_v2 = vmul.f32 %v1468_v31, %v3262_v28 }
 0xfd4   :  { %v1504_v26 = vrot.slane %v1468_v31, %v3433_v15  ;;  %v1131_v7 = vrot.slane %v1117_v5, %v3433_v15  ;;  %2508 = vmatpush3.bf16.msra.mxu0 %v2505_v36  ;;  %2502 = vmatprep.subr.bf16.mxu1 %v2501_v46  ;;  %v2509_v37 = vpack.c.bf16 %v2089_v27, %v2088_v35 }
 0xfd5   :  { %v1104_v13 = vrot.slane %v1090_v9, %v3433_v15  ;;  %1107 = vst.msk [vmem:[#allocation13 + $0x3] sm:$0x1] %vm453_vm6, %v1097_v52  ;;  %v1477_v0 = vrot.slane %v1469_v2, %v3433_v15  ;;  %v1672_v31 = vcombine.high %v1671_v17, %v1671_v17 }
 0xfd6   :  { %1340 = vst.msk [vmem:[#allocation13 + $0x3] sm:$0x1] %vm493_vm7, %v1335_v62  ;;  %v1723_v22 = vpop.permute.xlu0 %1722  ;;  %1140 = vrot.lane.b32.xlu1 %v1135_v51, %s2833_s25  ;;  %v1505_v54 = vcombine.high %v1504_v26, %v1504_v26  ;;  %v1512_v19 = vrot.slane %v1504_v26, %v3433_v15  ;;  %v1139_v40 = vrot.slane %v1131_v7, %v3040_v45 }
 0xfd7   :  { %1108 = vst.msk [vmem:[#allocation13 + $0xb] sm:$0x1] %vm453_vm6, %v1104_v13  ;;  %v1478_v33 = vcombine.high %v1477_v0, %v1477_v0  ;;  %v1485_v28 = vrot.slane %v1477_v0, %v3433_v15  ;;  %2510 = vmatprep.subr.bf16.mxu0 %v2509_v37  ;;  %2504 = vmatpush3.bf16.msra.mxu1 %v2501_v46 }
 0xfd8   :  { %1728 = vst.msk [vmem:[#allocation13 + $0x1] sm:$0x1] %vm493_vm7, %v1723_v22  ;;  %v1523_v41 = vrot.slane %v1512_v19, %v3040_v45  ;;  %v1519_v55 = vrot.slane %v1505_v54, %v3433_v15  ;;  %2512 = vmatpush3.bf16.msra.mxu0 %v2509_v37  ;;  %v1686_v51 = vrot.slane %v1672_v31, %v3433_v15  ;;  %v1936_v54 = vstv %s3703_s6 }
 0xfd9   :  { %v1492_v34 = vrot.slane %v1478_v33, %v3433_v15  ;;  %1495 = vst.msk [vmem:[#allocation13 + $0x5] sm:$0x1] %vm453_vm6, %v1485_v28 }
 0xfda   :  { %v1337_v38 = vpop.permute.xlu0 %1336  ;;  %706 = vrot.lane.b32.xlu1 %v703_v25, %s2833_s25  ;;  %v1527_v10 = vrot.slane %v1519_v55, %v3040_v45 }
 0xfdb   :  { %1341 = vst.msk [vmem:[#allocation13 + $0xb] sm:$0x1] %vm493_vm7, %v1337_v38 }
 0xfdc   :  { %1496 = vst.msk [vmem:[#allocation13 + $0xd] sm:$0x1] %vm453_vm6, %v1492_v34 }
 0xfde   :  { %v1725_v12 = vpop.permute.xlu0 %1724  ;;  %1142 = vrot.lane.b32.xlu1 %v1139_v40, %s2833_s25  ;;  %v1943_v40 = vsub.s32 %v3037_v44, %v3035_v43  ;;  %v2324_v43 = vld [vmem:[%s3707_s10] ss:$0 sm:$0xff] }
 0xfdf   :  { %1729 = vst.msk [vmem:[#allocation13 + $0x9] sm:$0x1] %vm493_vm7, %v1725_v12 }
 0xfe2   :  { %1528 = vrot.lane.b32.xlu1 %v1523_v41, %s2833_s25 }
 0xfe6   :  { %1530 = vrot.lane.b32.xlu1 %v1527_v10, %s2833_s25 }
0x103d   :  { %v1847_v61 = vpop.permute.xlu1 %1846 }
0x103e   :  { %v1849_v56 = vadd.f32 %v1847_v61, %v1843_v32  ;;  %v2649_v32 = vld [vmem:[%s3698_s1] sm:$0x3]  ;;  %s2835_s1 = smov [#allocation13]  }
0x103f   :  { %vm1919_vm8 = vcmp.gt.f32.partialorder %v2649_v32, 0.5  ;;  %s2267_s10 = sshll.u32 %s2835_s1, 4  ;;  %s2268_s10 = int_to_ptr.vmem [resolvable:$true] %s2267_s10 }
0x1040   :  { %v1850_v20 = vmul.f32 %v1849_v56, %v3186_v3  ;;  %v1885_v53 = vrot.slane %v1849_v56, %v3433_v15  ;;  %v1283_v3 = vrot.slane %v1275_v6, %v3433_v15  ;;  %s2760_s2 = scalar_lea.vmem %s2268_s10, 256  ;;  %p2765_p13 = scmp.lt.s32.totalorder %s2268_s10, %s2268_s10 }
0x1041   :  { %p2761_p12 = scmp.ne.s32.totalorder %s2268_s10, %s2760_s2  ;;  %p2766_p0 = scmp.lt.s32.totalorder %s2760_s2, %s2760_s2 }
0x1042   :  { %v1858_v39 = vrot.slane %v1850_v20, %v3433_v15  ;;  %v1886_v57 = vcombine.high %v1885_v53, %v1885_v53  ;;  %v1893_v60 = vrot.slane %v1885_v53, %v3433_v15  ;;  %v1291_v30 = vrot.slane %v1283_v3, %v3433_v15 }
0x1043   :  { %v1284_v52 = vcombine.high %v1283_v3, %v1283_v3  ;;  %p2767_p1 = por %p2766_p0, %p2765_p13 }
0x1044   :  { %v1859_v49 = vcombine.high %v1858_v39, %v1858_v39  ;;  %v1866_v18 = vrot.slane %v1858_v39, %v3433_v15  ;;  %v705_v21 = vpop.permute.xlu1 %704  ;;  %v1904_v23 = vrot.slane %v1893_v60, %v3040_v45  ;;  %v1900_v1 = vrot.slane %v1886_v57, %v3433_v15  ;;  %v2321_v39 = vld [vmem:[#allocation12] ss:$0 sm:$0xff] }
0x1045   :  { %710 = vst.msk [vmem:[#allocation13 + $0x6] sm:$0x1] %vm493_vm7, %v705_v21  ;;  %v1298_v5 = vrot.slane %v1284_v52, %v3433_v15  ;;  %p2768_p2 = pnand %p2767_p1, %p2761_p12 }
0x1046   :  { %v1873_v59 = vrot.slane %v1859_v49, %v3433_v15  ;;  %1876 = vst.msk [vmem:[#allocation13 + $0x7] sm:$0x1] %vm453_vm6, %v1866_v18  ;;  %1689 = vst.msk [vmem:[#allocation13 + $0x6] sm:$0x1] %vm453_vm6, %v1679_v42  ;;  %1909 = vrot.lane.b32.xlu1 %v1904_v23, %s2833_s25  ;;  %v1908_v9 = vrot.slane %v1900_v1, %v3040_v45  ;;  %v2320_v15 = vld [vmem:[%s3702_s5] ss:$0 sm:$0xff] }
0x1048   :  { %1877 = vst.msk [vmem:[#allocation13 + $0xf] sm:$0x1] %vm453_vm6, %v1873_v59  ;;  %v1141_v62 = vpop.permute.xlu1 %1140 }
0x1049   :  { %1146 = vst.msk [vmem:[#allocation13 + $0x4] sm:$0x1] %vm493_vm7, %v1141_v62 }
0x104a   :  { %1301 = vst.msk [vmem:[#allocation13 + $0x4] sm:$0x1] %vm453_vm6, %v1291_v30  ;;  %1911 = vrot.lane.b32.xlu1 %v1908_v9, %s2833_s25 }
0x104c   :  { %v707_v50 = vpop.permute.xlu1 %706 }
0x104d   :  { %711 = vst.msk [vmem:[#allocation13 + $0xe] sm:$0x1] %vm493_vm7, %v707_v50 }
0x104e   :  { %1690 = vst.msk [vmem:[#allocation13 + $0xe] sm:$0x1] %vm453_vm6, %v1686_v51 }
0x1050   :  { %v1143_v2 = vpop.permute.xlu1 %1142 }
0x1051   :  { %1147 = vst.msk [vmem:[#allocation13 + $0xc] sm:$0x1] %vm493_vm7, %v1143_v2 }
0x1052   :  { %1302 = vst.msk [vmem:[#allocation13 + $0xc] sm:$0x1] %vm453_vm6, %v1298_v5 }
0x1054   :  { %v1529_v13 = vpop.permute.xlu1 %1528 }
0x1055   :  { %1534 = vst.msk [vmem:[#allocation13 + $0x2] sm:$0x1] %vm493_vm7, %v1529_v13 }
0x1058   :  { %v1531_v0 = vpop.permute.xlu1 %1530 }
0x1059   :  { %1535 = vst.msk [vmem:[#allocation13 + $0xa] sm:$0x1] %vm493_vm7, %v1531_v0 }
0x10b8   :  { %v1910_v22 = vpop.permute.xlu1 %1909 }
0x10b9   :  { %1915 = vst.msk [vmem:[#allocation13] sm:$0x1] %vm493_vm7, %v1910_v22 }
0x10bc   :  { %v1912_v25 = vpop.permute.xlu1 %1911 }
0x10bd   :  { %1916 = vst.msk [vmem:[#allocation13 + $0x8] sm:$0x1] %vm493_vm7, %v1912_v25 }
0x10c0   :  { %v3614_v33 = vld [vmem:[#allocation13] sm:$0xff] }
0x10c1   :  { %2347 = vmatprep.mubr.msk.f32.mxu1 %vm138_vm0, %v3614_v33  ;;  %2358 = vmatprep.mubr.msk.f32.mxu0 %vm138_vm0, %v3614_v33  ;;  %v1927_v28 = vmul.f32 %v2320_v15, %v3614_v33 }
0x10c3   :  { %v1929_v26 = vsel %vm138_vm0, %v1927_v28, 0.0 }
0x10c4   :  { %1930 = vadd.xlane.f32.xlu0 %v1929_v26  ;;  %v3622_v7 = vld [vmem:[#allocation13 + $0x8] sm:$0xff] }
0x10c5   :  { %2348 = vmatmul.mubr.msk.f32.vlgmr.msra.gmra.mrb[8].mxu1 %vm138_vm0, %v3622_v7  ;;  %2359 = vmatmul.mubr.msk.f32.vlgmr.msra.gmra.mrb[12].mxu0 %vm138_vm0, %v3622_v7  ;;  %v1928_v34 = vmul.f32 %v2320_v15, %v3622_v7 }
0x10c7   :  { %v1932_v38 = vsel %vm138_vm0, %v1928_v34, 0.0 }
0x10c8   :  { %1933 = vadd.xlane.f32.xlu1 %v1932_v38 }
0x1151   :  { %v1931_v19 = vpop.xlane.xlu0 %1930 }
0x1152   :  { %v1937_v12 = vadd.f32 %v1936_v54, %v1931_v19 }
0x1154   :  { %v1944_v10 = vrot.slane %v1937_v12, %v1943_v40 }
0x1155   :  { %v1934_v41 = vpop.xlane.xlu1 %1933 }
0x1156   :  { %v1938_v55 = vadd.f32 %v1936_v54, %v1934_v41 }
0x1158   :  { %v1948_v8 = vrot.slane %v1938_v55, %v1943_v40 }
0x115a   :  { %v1949_v61 = vsel %vm277_vm2, %v1948_v8, %v1944_v10 }
0x115b   :  { %v1951_v58 = vsel %vm1919_vm8, %v1949_v61, -1e+30 }
0x115c   :  { %v1953_v63 = vsel %vm1952_vm9, %v1951_v58, -inf }
0x115d   :  { %1954 = vmax.xlane.f32.xlu1 %v1953_v63 }
0x1198   :  { %v2349_v44 = vpop.f32.mrb[8].mxu1  ;;  %v2360_v4 = vpop.f32.mrb[12].mxu0 }
0x1199   :  { %v2169_v56 = vadd.f32 %v2360_v4, %v2324_v43  ;;  %v2077_v48 = vpop.f32.mrb[9].mxu1  ;;  %v2163_v24 = vpop.f32.mrb[13].mxu0  ;;  %v2083_v42 = vadd.f32 %v2349_v44, %v2321_v39 }
0x119a   :  { %v2164_v11 = vadd.f32 %v2324_v43, %v2163_v24  ;;  %v2078_v49 = vadd.f32 %v2321_v39, %v2077_v48 }
0x119b   :  { %v2179_v14 = vsel %vm138_vm0, %v2169_v56, 0.0 }
0x119c   :  { %v2180_v6 = vrot.slane %v2179_v14, 4  ;;  %v2172_v17 = vsel %vm138_vm0, %v2164_v11, 0.0 }
0x119d   :  { %v2173_v36 = vrot.slane %v2172_v17, 4 }
0x119e   :  { %v2181_v46 = vadd.f32 %v2180_v6, %v2179_v14 }
0x119f   :  { %v2174_v20 = vadd.f32 %v2173_v36, %v2172_v17 }
0x11a0   :  { %v2182_v53 = vrot.slane %v2181_v46, 2 }
0x11a1   :  { %v2175_v35 = vrot.slane %v2174_v20, 2 }
0x11a2   :  { %v2183_v27 = vadd.f32 %v2182_v53, %v2181_v46 }
0x11a3   :  { %v2176_v57 = vadd.f32 %v2175_v35, %v2174_v20 }
0x11a4   :  { %v2184_v60 = vrot.slane %v2183_v27, 1 }
0x11a5   :  { %v2177_v3 = vrot.slane %v2176_v57, 1 }
0x11a6   :  { %v2185_v37 = vadd.f32 %v2184_v60, %v2183_v27 }
0x11a7   :  { %v2178_v18 = vadd.f32 %v2177_v3, %v2176_v57 }
0x11a8   :  { %v2187_v21 = vmul.f32 %v2185_v37, %v2083_v42 }
0x11a9   :  { %v2186_v23 = vmul.f32 %v2178_v18, %v2078_v49 }
0x11aa   :  { %v2191_v59 = vsel %vm138_vm0, %v2187_v21, 0.0 }
0x11ab   :  { %v2188_v1 = vsel %vm138_vm0, %v2186_v23, 0.0 }
0x11ac   :  { %2189 = vadd.xlane.f32.xlu0 %v2188_v1 }
0x11b0   :  { %2192 = vadd.xlane.f32.xlu0 %v2191_v59 }
0x11ea   :  { %v1955_v30 = vpop.xlane.xlu1 %1954 }
0x11eb   :  { %v1956_v31 = vsub.f32 %v1951_v58, %v1955_v30 }
0x11ed   :  { %v1957_v62 = vmul.f32 1.442695, %v1956_v31 }
0x11ef   :  { %2641 = vpow2.f32 %v1957_v62 }
0x11f9   :  { %v2642_v9 = vpop.eup %2641 }
0x11fa   :  { %v1959_v52 = vsel %vm1952_vm9, %v2642_v9, 0.0 }
0x11fb   :  { %1960 = vadd.xlane.f32.xlu1 %v1959_v52 }
0x1239   :  { %v2190_v51 = vpop.xlane.xlu0 %2189 }
0x123a   :  { %v2194_v50 = vmul.f32 0.17677669, %v2190_v51 }
0x123c   :  { %v2201_v13 = vrot.slane %v2194_v50, %v1943_v40 }
0x123d   :  { %v2193_v5 = vpop.xlane.xlu0 %2192 }
0x123e   :  { %v2195_v2 = vmul.f32 0.17677669, %v2193_v5 }
0x1240   :  { %v2205_v0 = vrot.slane %v2195_v2, %v1943_v40 }
0x1242   :  { %v2206_v22 = vsel %vm277_vm2, %v2205_v0, %v2201_v13 }
0x1243   :  { %v2208_v25 = vsel %vm1919_vm8, %v2206_v22, -1e+30 }
0x1244   :  { %v2209_v15 = vsel %vm1952_vm9, %v2208_v25, -inf }
0x1245   :  { %2210 = vmax.xlane.f32.xlu0 %v2209_v15 }
0x1288   :  { %v1961_v28 = vpop.xlane.xlu1 %1960 }
0x1289   :  { %2643 = vrcp.f32 %v1961_v28 }
0x1293   :  { %v2644_v26 = vpop.eup %2643 }
0x1294   :  { %v1963_v34 = vmul.f32 %v2644_v26, %v2642_v9 }
0x1296   :  { %v1967_v38 = vrot.slane %v1963_v34, %v3040_v45  ;;  %v1974_v55 = vrot.slane %v1963_v34, %v3046_v47 }
0x1298   :  { %1969 = vbcast.lane.b32.xlu1 %v1967_v38, 256 }
0x12d2   :  { %v2211_v54 = vpop.xlane.xlu0 %2210 }
0x12d3   :  { %v2212_v19 = vsub.f32 %v2208_v25, %v2211_v54 }
0x12d5   :  { %v2213_v12 = vmul.f32 1.442695, %v2212_v19 }
0x12d7   :  { %2645 = vpow2.f32 %v2213_v12 }
0x12e1   :  { %v2646_v41 = vpop.eup %2645 }
0x12e2   :  { %v2215_v40 = vsel %vm1952_vm9, %v2646_v41, 0.0 }
0x12e3   :  { %2216 = vadd.xlane.f32.xlu0 %v2215_v40 }
0x12f9   :  { %1976 = vbcast.lane.b32.xlu0 %v1974_v55, 256 }
0x1370   :  { %v2217_v10 = vpop.xlane.xlu0 %2216 }
0x1371   :  { %2647 = vrcp.f32 %v2217_v10 }
0x137b   :  { %v2648_v8 = vpop.eup %2647 }
0x137c   :  { %v2219_v32 = vmul.f32 %v2648_v8, %v2646_v41 }
0x137e   :  { %v2223_v61 = vrot.slane %v2219_v32, %v3040_v45  ;;  %v2230_v58 = vrot.slane %v2219_v32, %v3046_v47 }
0x1380   :  { %2225 = vbcast.lane.b32.xlu1 %v2223_v61, 256 }
0x1384   :  { %2232 = vbcast.lane.b32.xlu1 %v2230_v58, 256 }
0x1385   :  { %2771 = shalt.err (!%p2768_p2)
}
0x1386   :  { %s2772_s30 = scalar_lea.hbm %s3709_s12, 256 }
0x1387   :  { %p2773_p3 = scmp.ne.s32.totalorder %s3709_s12, %s2772_s30  ;;  %p2776_p4 = scmp.lt.u32.totalorder %s2772_s30, %s3709_s12 }
0x1389   :  { %p2778_p5 = pnand %p2776_p4, %p2773_p3 }
0x138b   :  { %2781 = shalt.err (!%p2778_p5)
}
0x138c   :  { %2273 = dma.vmem_to_hbm [thread:$0]  %s2268_s10, 256, %s3709_s12, [#allocation6], %s2819_s26, %s2819_s26, %s2820_s17   ;;  %v1970_v45 = vpop.permute.xlu1 %1969  ;;  %v1977_v47 = vpop.permute.xlu0 %1976  ;;  %vm2260_vm10 = vcmask 254976  }
0x138d   :  { %v1978_v63 = vmul.f32 %v1970_v45, %v3614_v33  ;;  %v1979_v43 = vmul.f32 %v1977_v47, %v3622_v7  ;;  %s2836_s12 = smov [#allocation14]  }
0x138e   :  { %s2280_s26 = sshll.u32 %s2836_s12, 4  ;;  %s2281_s26 = int_to_ptr.vmem [resolvable:$true] %s2280_s26 }
0x138f   :  { %v1980_v44 = vsel %vm138_vm0, %v1978_v63, 0.0  ;;  %v1987_v4 = vsel %vm138_vm0, %v1979_v43, 0.0  ;;  %s2782_s17 = scalar_lea.vmem %s2281_s26, 32  ;;  %p2787_p7 = scmp.lt.s32.totalorder %s2281_s26, %s2281_s26 }
0x1390   :  { %v1981_v56 = vrot.slane %v1980_v44, 4  ;;  %v1988_v48 = vrot.slane %v1987_v4, 4  ;;  %p2783_p6 = scmp.ne.s32.totalorder %s2281_s26, %s2782_s17  ;;  %p2788_p8 = scmp.lt.s32.totalorder %s2782_s17, %s2782_s17 }
0x1392   :  { %v1982_v24 = vadd.f32 %v1981_v56, %v1980_v44  ;;  %v1989_v11 = vadd.f32 %v1988_v48, %v1987_v4  ;;  %p2789_p9 = por %p2788_p8, %p2787_p7 }
0x1394   :  { %v1983_v36 = vrot.slane %v1982_v24, 2  ;;  %v1990_v46 = vrot.slane %v1989_v11, 2  ;;  %p2790_p10 = pnand %p2789_p9, %p2783_p6 }
0x1396   :  { %v1984_v57 = vadd.f32 %v1983_v36, %v1982_v24  ;;  %v1991_v60 = vadd.f32 %v1990_v46, %v1989_v11 }
0x1398   :  { %v1985_v18 = vrot.slane %v1984_v57, 1  ;;  %v1992_v21 = vrot.slane %v1991_v60, 1 }
0x139a   :  { %v1986_v30 = vadd.f32 %v1985_v18, %v1984_v57  ;;  %v1993_v31 = vadd.f32 %v1992_v21, %v1991_v60 }
0x139c   :  { %v2250_v52 = vmul.f32 %v1986_v30, %v3430_v29  ;;  %v2251_v51 = vmul.f32 %v1993_v31, %v3430_v29 }
0x13f2   :  { %v2226_v14 = vpop.permute.xlu1 %2225 }
0x13f3   :  { %v2234_v6 = vmul.f32 %v2226_v14, %v3614_v33 }
0x13f5   :  { %v2236_v17 = vsel %vm138_vm0, %v2234_v6, 0.0 }
0x13f6   :  { %v2237_v20 = vrot.slane %v2236_v17, 4  ;;  %v2233_v53 = vpop.permute.xlu1 %2232 }
0x13f7   :  { %v2235_v35 = vmul.f32 %v2233_v53, %v3622_v7 }
0x13f8   :  { %v2238_v27 = vadd.f32 %v2237_v20, %v2236_v17 }
0x13f9   :  { %v2243_v39 = vsel %vm138_vm0, %v2235_v35, 0.0 }
0x13fa   :  { %v2239_v3 = vrot.slane %v2238_v27, 2  ;;  %v2244_v42 = vrot.slane %v2243_v39, 4 }
0x13fc   :  { %v2240_v37 = vadd.f32 %v2239_v3, %v2238_v27  ;;  %v2245_v49 = vadd.f32 %v2244_v42, %v2243_v39 }
0x13fe   :  { %v2241_v33 = vrot.slane %v2240_v37, 1  ;;  %v2246_v23 = vrot.slane %v2245_v49, 2 }
0x1400   :  { %v2242_v1 = vadd.f32 %v2241_v33, %v2240_v37  ;;  %v2247_v59 = vadd.f32 %v2246_v23, %v2245_v49 }
0x1402   :  { %v2248_v62 = vrot.slane %v2247_v59, 1  ;;  %v2252_v7 = vmul.f32 %v2242_v1, %v3412_v16 }
0x1404   :  { %v2249_v9 = vadd.f32 %v2248_v62, %v2247_v59  ;;  %v2254_v5 = vadd.f32 %v2252_v7, %v2250_v52 }
0x1406   :  { %v2253_v50 = vmul.f32 %v2249_v9, %v3412_v16 }
0x1408   :  { %v2255_v2 = vadd.f32 %v2253_v50, %v2251_v51 }
0x140a   :  { %v2258_v13 = vsel %vm277_vm2, %v2255_v2, %v2254_v5 }
0x140b   :  { %2261 = vst.msk [vmem:[#allocation14] sm:$0x3] %vm2260_vm10, %v2258_v13 }
0x140c   :  { %2793 = shalt.err (!%p2790_p10)
}
0x140d   :  { %s2794_s20 = scalar_lea.hbm %s3710_s13, 32 }
0x140e   :  { %p2795_p11 = scmp.ne.s32.totalorder %s3710_s13, %s2794_s20  ;;  %p2798_p12 = scmp.lt.u32.totalorder %s2794_s20, %s3710_s13 }
0x1410   :  { %p2800_p13 = pnand %p2798_p12, %p2795_p11 }
0x1412   :  { %2803 = shalt.err (!%p2800_p13)
}
0x1413   :  { %2283 = dma.vmem_to_hbm [thread:$0]  %s2281_s26, 32, %s3710_s13, [#allocation15]  }
0x1414   :  { %2810 = dma.done.wait [#allocation6], 256  }
0x1415   :  { %2811 = vsyncadd [#allocation6], 4294967040 }
0x1416   :  { %2812 = dma.done.wait [#allocation15], 32  }
0x1417   :  { %2813 = vsyncadd [#allocation15], 4294967264 }
0x1418   :  { %2290 = vsyncpa [#allocation5], 1 }
0x1419   :  { %2291 = vsyncpa [#allocation8], 1 }
0x141a   :  { %2292 = vsyncpa [#allocation11], 1 }
0x141b   :  { %2293 = vsyncpa [#allocation6], 1 }
0x141c   :  { %2294 = vsyncpa [#allocation15], 1 }

</bundles_post_ra>
